<compile_context>
chip_gen: v7x
topology: tpu7x:2x2x1
jax: 0.10.0
libtpu: 0.0.40
codegen_flags: <defaults>
</compile_context>

<pallas_src>
import functools
import math

import jax
import jax.numpy as jnp
from jax.experimental import pallas as pl
from jax.experimental.pallas import tpu as pltpu

EPS = 1e-6
NEG_INF = -1e9  # additive mask bias (scores are accumulated in f32)


def _layernorm(x, alpha, beta):
    # x: (T, H) f32; alpha, beta: (1, H) f32
    H = x.shape[-1]
    mean = jnp.mean(x, axis=-1, keepdims=True)
    var = jnp.sum((x - mean) ** 2, axis=-1, keepdims=True) / (H - 1)  # unbiased (torch.std)
    return alpha * (x - mean) / jnp.sqrt(var + EPS) + beta


def encoder_kernel(x_ref, bias_ref,
                   ln1a_ref, ln1b_ref,
                   wqkv_ref, bqkv_ref,
                   wo_ref, bo_ref,
                   ln2a_ref, ln2b_ref,
                   w1_ref, b1_ref, w2_ref, b2_ref,
                   flna_ref, flnb_ref,
                   o_ref, *, n_heads):
    l = pl.program_id(1)
    n_layers = pl.num_programs(1)

    # Residual stream lives in the VMEM-resident output block across the layer
    # axis (output block index is constant in l); initialize it from the input.
    @pl.when(l == 0)
    def _():
        o_ref[0] = x_ref[0]

    x = o_ref[0]                                    # (T, H) f32
    T, H = x.shape
    d_k = H // n_heads
    bf16 = jnp.bfloat16

    bias = bias_ref[0].astype(jnp.float32)          # (T, T) additive mask bias

    # ---- self-attention sublayer: x + attn(norm(x)) ----
    xn = _layernorm(x, ln1a_ref[0], ln1b_ref[0]).astype(bf16)

    # fused QKV projection (1/sqrt(d_k) already folded into the Q slice)
    qkv = jnp.dot(xn, wqkv_ref[0], preferred_element_type=jnp.float32) + bqkv_ref[0]
    q, k, v = qkv[:, :H], qkv[:, H:2 * H], qkv[:, 2 * H:]

    def heads(z):  # (T, H) -> (n_heads, T, d_k), bf16
        return jnp.transpose(z.reshape(T, n_heads, d_k), (1, 0, 2)).astype(bf16)

    qh, kh, vh = heads(q), heads(k), heads(v)

    # batched QK^T without materializing a transpose of K
    scores = jnp.einsum('ntd,nsd->nts', qh, kh,
                        preferred_element_type=jnp.float32)      # (n, T, T) f32
    scores = scores + bias[None]

    m = jnp.max(scores, axis=-1, keepdims=True)
    e = jnp.exp(scores - m)
    denom = jnp.sum(e, axis=-1, keepdims=True)
    p = (e * pl.reciprocal(denom, approx=True)).astype(bf16)     # (n, T, T)

    ctx = jnp.einsum('nts,nsd->ntd', p, vh,
                     preferred_element_type=jnp.float32)         # (n, T, d_k) f32

    # merge heads (XLU transpose) then one full-depth K=H output projection
    ctx_m = jnp.transpose(ctx, (1, 0, 2)).reshape(T, H).astype(bf16)
    attn = jnp.dot(ctx_m, wo_ref[0], preferred_element_type=jnp.float32) + bo_ref[0]

    x = x + attn  # TODO(synk): dropout omitted (eval mode / identity)

    # ---- feed-forward sublayer: x + ffn(norm(x)) ----
    xn2 = _layernorm(x, ln2a_ref[0], ln2b_ref[0]).astype(bf16)
    hdn = jnp.maximum(
        jnp.dot(xn2, w1_ref[0], preferred_element_type=jnp.float32) + b1_ref[0],
        0.0)
    ffn = jnp.dot(hdn.astype(bf16), w2_ref[0],
                  preferred_element_type=jnp.float32) + b2_ref[0]
    x = x + ffn

    # ---- write back residual / fused final LayerNorm on the last layer ----
    @pl.when(l == n_layers - 1)
    def _():
        o_ref[0] = _layernorm(x, flna_ref[...], flnb_ref[...])

    @pl.when(l < n_layers - 1)
    def _():
        o_ref[0] = x


def _vmem_limit_bytes():
    # Per-generation scoped-VMEM request: ~3/4 of physical, capped at 96 MiB
    # (v5e/v6e: 96 MiB of 128 MiB; v7x: 48 MiB of its 64 MiB per-TC VMEM).
    try:
        cap = int(pltpu.get_tpu_info().vmem_capacity_bytes)
        return max(16 * 1024 * 1024, min(cap * 3 // 4, 96 * 1024 * 1024))
    except Exception:
        return 32 * 1024 * 1024


def _stack_layer_params(layer_params, n_heads):
    """Stack per-layer params along a leading layer axis; fuse QKV; cast
    matmul weights to bf16; fold 1/sqrt(d_k) into the Q projection."""
    H = layer_params[0]["wq"].shape[0]
    d_k = H // n_heads
    scale = 1.0 / math.sqrt(d_k)
    bf16 = jnp.bfloat16

    def per_layer(p):
        wqkv = jnp.concatenate([p["wq"] * scale, p["wk"], p["wv"]], axis=1)
        bqkv = jnp.concatenate([p["bq"] * scale, p["bk"], p["bv"]], axis=1)
        return {
            "ln1_a": p["ln1_a"], "ln1_b": p["ln1_b"],
            "wqkv": wqkv.astype(bf16), "bqkv": bqkv,
            "wo": p["wo"].astype(bf16), "bo": p["bo"],
            "ln2_a": p["ln2_a"], "ln2_b": p["ln2_b"],
            "w1": p["w1"].astype(bf16), "b1": p["b1"],
            "w2": p["w2"].astype(bf16), "b2": p["b2"],
        }

    per = [per_layer(p) for p in layer_params]
    return {k: jnp.stack([q[k] for q in per], axis=0) for k in per[0]}


def encoder_forward(x, mask, layer_params, final_norm_params, n_heads):
    B, T, H = x.shape
    L = len(layer_params)
    stacked = _stack_layer_params(layer_params, n_heads)

    # additive attention bias, precomputed once in bf16 (halves mask DMA bytes)
    bias = jnp.where(mask > 0, 0.0, NEG_INF).astype(jnp.bfloat16)

    def layer_spec(shape):
        nd = len(shape)
        return pl.BlockSpec((1,) + tuple(shape[1:]),
                            lambda b, l, _nd=nd: (l,) + (0,) * (_nd - 1))

    def const_spec(shape):
        nd = len(shape)
        return pl.BlockSpec(tuple(shape), lambda b, l, _nd=nd: (0,) * _nd)

    in_specs = [
        pl.BlockSpec((1, T, H), lambda b, l: (b, 0, 0)),   # x (read at l == 0)
        pl.BlockSpec((1, T, T), lambda b, l: (b, 0, 0)),   # additive mask bias
        layer_spec(stacked["ln1_a"].shape), layer_spec(stacked["ln1_b"].shape),
        layer_spec(stacked["wqkv"].shape), layer_spec(stacked["bqkv"].shape),
        layer_spec(stacked["wo"].shape), layer_spec(stacked["bo"].shape),
        layer_spec(stacked["ln2_a"].shape), layer_spec(stacked["ln2_b"].shape),
        layer_spec(stacked["w1"].shape), layer_spec(stacked["b1"].shape),
        layer_spec(stacked["w2"].shape), layer_spec(stacked["b2"].shape),
        const_spec(final_norm_params["alpha"].shape),
        const_spec(final_norm_params["beta"].shape),
    ]

    kernel = functools.partial(encoder_kernel, n_heads=n_heads)
    return pl.pallas_call(
        kernel,
        out_shape=jax.ShapeDtypeStruct((B, T, H), jnp.float32),
        grid_spec=pltpu.PrefetchScalarGridSpec(
            num_scalar_prefetch=0,
            grid=(B, L),                              # L innermost: residual stays in VMEM
            in_specs=in_specs,
            out_specs=pl.BlockSpec((1, T, H), lambda b, l: (b, 0, 0)),
        ),
        compiler_params=pltpu.CompilerParams(
            dimension_semantics=("parallel", "arbitrary"),
            vmem_limit_bytes=_vmem_limit_bytes(),
        ),
    )(x, bias,
      stacked["ln1_a"], stacked["ln1_b"],
      stacked["wqkv"], stacked["bqkv"],
      stacked["wo"], stacked["bo"],
      stacked["ln2_a"], stacked["ln2_b"],
      stacked["w1"], stacked["b1"],
      stacked["w2"], stacked["b2"],
      final_norm_params["alpha"], final_norm_params["beta"])


def encoder_reference(x, mask, layer_params, final_norm_params, n_heads):
    """Pure-JAX f32 reference mirroring the PyTorch module semantics."""
    def layernorm(z, a, b):
        H = z.shape[-1]
        mean = jnp.mean(z, -1, keepdims=True)
        var = jnp.sum((z - mean) ** 2, -1, keepdims=True) / (H - 1)
        return a * (z - mean) / jnp.sqrt(var + EPS) + b

    B, T, H = x.shape
    d_k = H // n_heads
    for p in layer_params:
        xn = layernorm(x, p["ln1_a"], p["ln1_b"])
        q = xn @ p["wq"] + p["bq"]
        k = xn @ p["wk"] + p["bk"]
        v = xn @ p["wv"] + p["bv"]

        def split(z):
            return z.reshape(B, T, n_heads, d_k).transpose(0, 2, 1, 3)

        qh, kh, vh = split(q), split(k), split(v)
        scores = (qh @ kh.transpose(0, 1, 3, 2)) / math.sqrt(d_k)
        scores = jnp.where(mask[:, None] > 0, scores, NEG_INF)
        pmat = jax.nn.softmax(scores, axis=-1)
        ctx = (pmat @ vh).transpose(0, 2, 1, 3).reshape(B, T, H)
        x = x + (ctx @ p["wo"] + p["bo"])

        xn2 = layernorm(x, p["ln2_a"], p["ln2_b"])
        ffn = jnp.maximum(xn2 @ p["w1"] + p["b1"], 0.0) @ p["w2"] + p["b2"]
        x = x + ffn
    return layernorm(x, final_norm_params["alpha"], final_norm_params["beta"])


def init_layer_params(key, H, d_ff):
    ks = jax.random.split(key, 6)
    s = 0.1
    return {
        "ln1_a": jnp.ones((1, H), jnp.float32),
        "ln1_b": jnp.zeros((1, H), jnp.float32),
        "wq": s * jax.random.normal(ks[0], (H, H), jnp.float32),
        "bq": jnp.zeros((1, H), jnp.float32),
        "wk": s * jax.random.normal(ks[1], (H, H), jnp.float32),
        "bk": jnp.zeros((1, H), jnp.float32),
        "wv": s * jax.random.normal(ks[2], (H, H), jnp.float32),
        "bv": jnp.zeros((1, H), jnp.float32),
        "wo": s * jax.random.normal(ks[3], (H, H), jnp.float32),
        "bo": jnp.zeros((1, H), jnp.float32),
        "ln2_a": jnp.ones((1, H), jnp.float32),
        "ln2_b": jnp.zeros((1, H), jnp.float32),
        "w1": s * jax.random.normal(ks[4], (H, d_ff), jnp.float32),
        "b1": jnp.zeros((1, d_ff), jnp.float32),
        "w2": s * jax.random.normal(ks[5], (d_ff, H), jnp.float32),
        "b2": jnp.zeros((1, H), jnp.float32),
    }


if __name__ == "__main__":
    B, T, H = 2, 8, 32
    n_heads, d_ff, n_layers = 4, 64, 2

    key = jax.random.PRNGKey(0)
    k_x, k_p = jax.random.split(key)
    x = jax.random.normal(k_x, (B, T, H), jnp.float32)

    # padding-style mask: batch 1 masks out the last 2 key positions
    mask = jnp.ones((B, T, T), jnp.float32)
    mask = mask.at[1, :, T - 2:].set(0.0)

    layer_keys = jax.random.split(k_p, n_layers)
    layer_params = [init_layer_params(k, H, d_ff) for k in layer_keys]
    final_norm_params = {
        "alpha": jnp.ones((1, H), jnp.float32),
        "beta": jnp.zeros((1, H), jnp.float32),
    }

    out = encoder_forward(x, mask, layer_params, final_norm_params, n_heads)
    out = jax.block_until_ready(out)

    assert out.shape == (B, T, H)
    assert bool(jnp.all(jnp.isfinite(out)))

    ref = encoder_reference(x, mask, layer_params, final_norm_params, n_heads)
    err = float(jnp.max(jnp.abs(out - ref)))
    assert err < 0.25, f"max abs err vs f32 reference: {err}"  # bf16 weights + approx recip
    print("KERNEL_OK")
</pallas_src>

<mosaic_0001>
module attributes {stable_mosaic.version = 11 : i64} {
  func.func @encoder_kernel(%arg0: i32, %arg1: i32, %arg2: memref<1x8x32xf32, #tpu.memory_space<vmem>>, %arg3: memref<1x8x8xbf16, #tpu.memory_space<vmem>>, %arg4: memref<1x1x32xf32, #tpu.memory_space<vmem>>, %arg5: memref<1x1x32xf32, #tpu.memory_space<vmem>>, %arg6: memref<1x32x96xbf16, #tpu.memory_space<vmem>>, %arg7: memref<1x1x96xf32, #tpu.memory_space<vmem>>, %arg8: memref<1x32x32xbf16, #tpu.memory_space<vmem>>, %arg9: memref<1x1x32xf32, #tpu.memory_space<vmem>>, %arg10: memref<1x1x32xf32, #tpu.memory_space<vmem>>, %arg11: memref<1x1x32xf32, #tpu.memory_space<vmem>>, %arg12: memref<1x32x64xbf16, #tpu.memory_space<vmem>>, %arg13: memref<1x1x64xf32, #tpu.memory_space<vmem>>, %arg14: memref<1x64x32xbf16, #tpu.memory_space<vmem>>, %arg15: memref<1x1x32xf32, #tpu.memory_space<vmem>>, %arg16: memref<1x32xf32, #tpu.memory_space<vmem>>, %arg17: memref<1x32xf32, #tpu.memory_space<vmem>>, %arg18: memref<1x8x32xf32, #tpu.memory_space<vmem>>) attributes {dimension_semantics = [#tpu.dimension_semantics<parallel>, #tpu.dimension_semantics<arbitrary>], iteration_bounds = array<i64: 2, 2>, scalar_prefetch = 0 : i64, scratch_operands = 0 : i64, tpu.core_type = #tpu.core_type<tc>, window_params = [{transform_indices = @transform_0, window_bounds = array<i64: 1, 8, 32>}, {transform_indices = @transform_1, window_bounds = array<i64: 1, 8, 8>}, {transform_indices = @transform_2, window_bounds = array<i64: 1, 1, 32>}, {transform_indices = @transform_3, window_bounds = array<i64: 1, 1, 32>}, {transform_indices = @transform_4, window_bounds = array<i64: 1, 32, 96>}, {transform_indices = @transform_5, window_bounds = array<i64: 1, 1, 96>}, {transform_indices = @transform_6, window_bounds = array<i64: 1, 32, 32>}, {transform_indices = @transform_7, window_bounds = array<i64: 1, 1, 32>}, {transform_indices = @transform_8, window_bounds = array<i64: 1, 1, 32>}, {transform_indices = @transform_9, window_bounds = array<i64: 1, 1, 32>}, {transform_indices = @transform_10, window_bounds = array<i64: 1, 32, 64>}, {transform_indices = @transform_11, window_bounds = array<i64: 1, 1, 64>}, {transform_indices = @transform_12, window_bounds = array<i64: 1, 64, 32>}, {transform_indices = @transform_13, window_bounds = array<i64: 1, 1, 32>}, {pipeline_mode = #tpu.pipeline_mode<synchronous>, transform_indices = @transform_14, window_bounds = array<i64: 1, 32>}, {pipeline_mode = #tpu.pipeline_mode<synchronous>, transform_indices = @transform_15, window_bounds = array<i64: 1, 32>}, {transform_indices = @transform_16, window_bounds = array<i64: 1, 8, 32>}]} {
    %c0_i32 = arith.constant 0 : i32
    %0 = arith.cmpi eq, %arg1, %c0_i32 : i32
    %1 = arith.extui %0 : i1 to i32
    %c0_i32_0 = arith.constant 0 : i32
    %2 = arith.cmpi ne, %1, %c0_i32_0 : i32
    scf.if %2 {
      %c0_63 = arith.constant 0 : index
      %c0_64 = arith.constant 0 : index
      %c0_65 = arith.constant 0 : index
      %132 = vector.load %arg2[%c0_63, %c0_64, %c0_65] : memref<1x8x32xf32, #tpu.memory_space<vmem>>, vector<1x8x32xf32>
      %133 = vector.shape_cast %132 : vector<1x8x32xf32> to vector<8x32xf32>
      %c0_66 = arith.constant 0 : index
      %c0_67 = arith.constant 0 : index
      %c0_68 = arith.constant 0 : index
      %134 = vector.load %arg18[%c0_66, %c0_67, %c0_68] : memref<1x8x32xf32, #tpu.memory_space<vmem>>, vector<1x8x32xf32>
      %135 = vector.shape_cast %134 : vector<1x8x32xf32> to vector<8x32xf32>
      %136 = vector.shape_cast %133 : vector<8x32xf32> to vector<1x8x32xf32>
      tpu.vector_store %arg18[%c0_66, %c0_67, %c0_68], %136 {strides = array<i32>} : memref<1x8x32xf32, #tpu.memory_space<vmem>>, vector<1x8x32xf32>,
    } else {
    }
    %c0 = arith.constant 0 : index
    %c0_1 = arith.constant 0 : index
    %c0_2 = arith.constant 0 : index
    %3 = vector.load %arg18[%c0, %c0_1, %c0_2] : memref<1x8x32xf32, #tpu.memory_space<vmem>>, vector<1x8x32xf32>
    %4 = vector.shape_cast %3 : vector<1x8x32xf32> to vector<8x32xf32>
    %c0_3 = arith.constant 0 : index
    %c0_4 = arith.constant 0 : index
    %c0_5 = arith.constant 0 : index
    %5 = vector.load %arg3[%c0_3, %c0_4, %c0_5] : memref<1x8x8xbf16, #tpu.memory_space<vmem>>, vector<1x8x8xbf16>
    %6 = vector.shape_cast %5 : vector<1x8x8xbf16> to vector<8x8xbf16>
    %7 = arith.extf %6 : vector<8x8xbf16> to vector<8x8xf32>
    %c0_6 = arith.constant 0 : index
    %c0_7 = arith.constant 0 : index
    %c0_8 = arith.constant 0 : index
    %8 = vector.load %arg4[%c0_6, %c0_7, %c0_8] : memref<1x1x32xf32, #tpu.memory_space<vmem>>, vector<1x1x32xf32>
    %9 = vector.shape_cast %8 : vector<1x1x32xf32> to vector<1x32xf32>
    %c0_9 = arith.constant 0 : index
    %c0_10 = arith.constant 0 : index
    %c0_11 = arith.constant 0 : index
    %10 = vector.load %arg5[%c0_9, %c0_10, %c0_11] : memref<1x1x32xf32, #tpu.memory_space<vmem>>, vector<1x1x32xf32>
    %11 = vector.shape_cast %10 : vector<1x1x32xf32> to vector<1x32xf32>
    %cst = arith.constant dense<0.000000e+00> : vector<8xf32>
    %12 = vector.multi_reduction <add>, %4, %cst [1] : vector<8x32xf32> to vector<8xf32>
    %13 = vector.shape_cast %12 : vector<8xf32> to vector<8x1xf32>
    %cst_12 = arith.constant 3.200000e+01 : f32
    %14 = vector.broadcast %cst_12 : f32 to vector<8x1xf32>
    %15 = arith.divf %13, %14 : vector<8x1xf32>
    %16 = vector.broadcast %15 : vector<8x1xf32> to vector<8x32xf32>
    %17 = arith.subf %4, %16 : vector<8x32xf32>
    %18 = arith.mulf %17, %17 : vector<8x32xf32>
    %cst_13 = arith.constant dense<0.000000e+00> : vector<8xf32>
    %19 = vector.multi_reduction <add>, %18, %cst_13 [1] : vector<8x32xf32> to vector<8xf32>
    %20 = vector.shape_cast %19 : vector<8xf32> to vector<8x1xf32>
    %cst_14 = arith.constant 3.100000e+01 : f32
    %21 = vector.broadcast %cst_14 : f32 to vector<8x1xf32>
    %22 = arith.divf %20, %21 : vector<8x1xf32>
    %23 = vector.broadcast %15 : vector<8x1xf32> to vector<8x32xf32>
    %24 = arith.subf %4, %23 : vector<8x32xf32>
    %25 = vector.broadcast %9 : vector<1x32xf32> to vector<8x32xf32>
    %26 = arith.mulf %25, %24 : vector<8x32xf32>
    %cst_15 = arith.constant 9.99999997E-7 : f32
    %27 = vector.broadcast %cst_15 : f32 to vector<8x1xf32>
    %28 = arith.addf %22, %27 : vector<8x1xf32>
    %29 = math.sqrt %28 : vector<8x1xf32>
    %30 = vector.broadcast %29 : vector<8x1xf32> to vector<8x32xf32>
    %31 = arith.divf %26, %30 : vector<8x32xf32>
    %32 = vector.broadcast %11 : vector<1x32xf32> to vector<8x32xf32>
    %33 = arith.addf %31, %32 : vector<8x32xf32>
    %34 = arith.truncf %33 : vector<8x32xf32> to vector<8x32xbf16>
    %c0_16 = arith.constant 0 : index
    %c0_17 = arith.constant 0 : index
    %c0_18 = arith.constant 0 : index
    %35 = vector.load %arg6[%c0_16, %c0_17, %c0_18] : memref<1x32x96xbf16, #tpu.memory_space<vmem>>, vector<1x32x96xbf16>
    %36 = vector.shape_cast %35 : vector<1x32x96xbf16> to vector<32x96xbf16>
    %cst_19 = arith.constant dense<0.000000e+00> : vector<8x96xf32>
    %37 = tpu.matmul %34, %36, %cst_19 {dimension_numbers = #tpu.dot_dimension_numbers<[1], [0], [0], [1], [0, 0, 1, 1], [], []>} : vector<8x32xbf16>, vector<32x96xbf16>, vector<8x96xf32> -> vector<8x96xf32>
    %c0_20 = arith.constant 0 : index
    %c0_21 = arith.constant 0 : index
    %c0_22 = arith.constant 0 : index
    %38 = vector.load %arg7[%c0_20, %c0_21, %c0_22] : memref<1x1x96xf32, #tpu.memory_space<vmem>>, vector<1x1x96xf32>
    %39 = vector.shape_cast %38 : vector<1x1x96xf32> to vector<1x96xf32>
    %40 = vector.broadcast %39 : vector<1x96xf32> to vector<8x96xf32>
    %41 = arith.addf %37, %40 : vector<8x96xf32>
    %42 = vector.extract_strided_slice %41 {offsets = [0, 0], sizes = [8, 32], strides = [1, 1]} : vector<8x96xf32> to vector<8x32xf32>
    %43 = vector.extract_strided_slice %41 {offsets = [0, 32], sizes = [8, 32], strides = [1, 1]} : vector<8x96xf32> to vector<8x32xf32>
    %44 = vector.extract_strided_slice %41 {offsets = [0, 64], sizes = [8, 32], strides = [1, 1]} : vector<8x96xf32> to vector<8x32xf32>
    %45 = vector.shape_cast %42 : vector<8x32xf32> to vector<8x4x8xf32>
    %46 = tpu.transpose %45, [1, 0, 2] : vector<8x4x8xf32> -> vector<4x8x8xf32>
    %47 = arith.truncf %46 : vector<4x8x8xf32> to vector<4x8x8xbf16>
    %48 = vector.shape_cast %43 : vector<8x32xf32> to vector<8x4x8xf32>
    %49 = tpu.transpose %48, [1, 0, 2] : vector<8x4x8xf32> -> vector<4x8x8xf32>
    %50 = arith.truncf %49 : vector<4x8x8xf32> to vector<4x8x8xbf16>
    %51 = vector.shape_cast %44 : vector<8x32xf32> to vector<8x4x8xf32>
    %52 = tpu.transpose %51, [1, 0, 2] : vector<8x4x8xf32> -> vector<4x8x8xf32>
    %53 = arith.truncf %52 : vector<4x8x8xf32> to vector<4x8x8xbf16>
    "tpu.trace_start"() <{level = 10 : i32, message = "ntd,nsd->nts"}> : () -> ()
    %cst_23 = arith.constant dense<0.000000e+00> : vector<4x8x8xf32>
    %54 = tpu.matmul %47, %50, %cst_23 {dimension_numbers = #tpu.dot_dimension_numbers<[2], [2], [1], [1], [0, 0, 0, 1, 1, 1], [0], [0]>} : vector<4x8x8xbf16>, vector<4x8x8xbf16>, vector<4x8x8xf32> -> vector<4x8x8xf32>
    "tpu.trace_stop"() : () -> ()
    %55 = vector.shape_cast %7 : vector<8x8xf32> to vector<1x8x8xf32>
    %56 = vector.broadcast %55 : vector<1x8x8xf32> to vector<4x8x8xf32>
    %57 = arith.addf %54, %56 : vector<4x8x8xf32>
    %cst_24 = arith.constant dense<0xFF800000> : vector<4x8xf32>
    %58 = vector.multi_reduction <maximumf>, %57, %cst_24 [2] : vector<4x8x8xf32> to vector<4x8xf32>
    %59 = vector.shape_cast %58 : vector<4x8xf32> to vector<4x8x1xf32>
    %60 = vector.broadcast %59 : vector<4x8x1xf32> to vector<4x8x8xf32>
    %61 = arith.subf %57, %60 : vector<4x8x8xf32>
    %62 = math.exp %61 : vector<4x8x8xf32>
    %cst_25 = arith.constant dense<0.000000e+00> : vector<4x8xf32>
    %63 = vector.multi_reduction <add>, %62, %cst_25 [2] : vector<4x8x8xf32> to vector<4x8xf32>
    %64 = vector.shape_cast %63 : vector<4x8xf32> to vector<4x8x1xf32>
    %65 = tpu.reciprocal %64 {approx = true} : vector<4x8x1xf32> -> vector<4x8x1xf32>
    %66 = vector.broadcast %65 : vector<4x8x1xf32> to vector<4x8x8xf32>
    %67 = arith.mulf %62, %66 : vector<4x8x8xf32>
    %68 = arith.truncf %67 : vector<4x8x8xf32> to vector<4x8x8xbf16>
    "tpu.trace_start"() <{level = 10 : i32, message = "nts,nsd->ntd"}> : () -> ()
    %cst_26 = arith.constant dense<0.000000e+00> : vector<4x8x8xf32>
    %69 = tpu.matmul %68, %53, %cst_26 {dimension_numbers = #tpu.dot_dimension_numbers<[2], [1], [1], [2], [0, 0, 0, 1, 1, 2], [0], [0]>} : vector<4x8x8xbf16>, vector<4x8x8xbf16>, vector<4x8x8xf32> -> vector<4x8x8xf32>
    "tpu.trace_stop"() : () -> ()
    %70 = tpu.transpose %69, [1, 0, 2] : vector<4x8x8xf32> -> vector<8x4x8xf32>
    %71 = vector.shape_cast %70 : vector<8x4x8xf32> to vector<8x32xf32>
    %72 = arith.truncf %71 : vector<8x32xf32> to vector<8x32xbf16>
    %c0_27 = arith.constant 0 : index
    %c0_28 = arith.constant 0 : index
    %c0_29 = arith.constant 0 : index
    %73 = vector.load %arg8[%c0_27, %c0_28, %c0_29] : memref<1x32x32xbf16, #tpu.memory_space<vmem>>, vector<1x32x32xbf16>
    %74 = vector.shape_cast %73 : vector<1x32x32xbf16> to vector<32x32xbf16>
    %cst_30 = arith.constant dense<0.000000e+00> : vector<8x32xf32>
    %75 = tpu.matmul %72, %74, %cst_30 {dimension_numbers = #tpu.dot_dimension_numbers<[1], [0], [0], [1], [0, 0, 1, 1], [], []>} : vector<8x32xbf16>, vector<32x32xbf16>, vector<8x32xf32> -> vector<8x32xf32>
    %c0_31 = arith.constant 0 : index
    %c0_32 = arith.constant 0 : index
    %c0_33 = arith.constant 0 : index
    %76 = vector.load %arg9[%c0_31, %c0_32, %c0_33] : memref<1x1x32xf32, #tpu.memory_space<vmem>>, vector<1x1x32xf32>
    %77 = vector.shape_cast %76 : vector<1x1x32xf32> to vector<1x32xf32>
    %78 = vector.broadcast %77 : vector<1x32xf32> to vector<8x32xf32>
    %79 = arith.addf %75, %78 : vector<8x32xf32>
    %80 = arith.addf %4, %79 : vector<8x32xf32>
    %c0_34 = arith.constant 0 : index
    %c0_35 = arith.constant 0 : index
    %c0_36 = arith.constant 0 : index
    %81 = vector.load %arg10[%c0_34, %c0_35, %c0_36] : memref<1x1x32xf32, #tpu.memory_space<vmem>>, vector<1x1x32xf32>
    %82 = vector.shape_cast %81 : vector<1x1x32xf32> to vector<1x32xf32>
    %c0_37 = arith.constant 0 : index
    %c0_38 = arith.constant 0 : index
    %c0_39 = arith.constant 0 : index
    %83 = vector.load %arg11[%c0_37, %c0_38, %c0_39] : memref<1x1x32xf32, #tpu.memory_space<vmem>>, vector<1x1x32xf32>
    %84 = vector.shape_cast %83 : vector<1x1x32xf32> to vector<1x32xf32>
    %cst_40 = arith.constant dense<0.000000e+00> : vector<8xf32>
    %85 = vector.multi_reduction <add>, %80, %cst_40 [1] : vector<8x32xf32> to vector<8xf32>
    %86 = vector.shape_cast %85 : vector<8xf32> to vector<8x1xf32>
    %cst_41 = arith.constant 3.200000e+01 : f32
    %87 = vector.broadcast %cst_41 : f32 to vector<8x1xf32>
    %88 = arith.divf %86, %87 : vector<8x1xf32>
    %89 = vector.broadcast %88 : vector<8x1xf32> to vector<8x32xf32>
    %90 = arith.subf %80, %89 : vector<8x32xf32>
    %91 = arith.mulf %90, %90 : vector<8x32xf32>
    %cst_42 = arith.constant dense<0.000000e+00> : vector<8xf32>
    %92 = vector.multi_reduction <add>, %91, %cst_42 [1] : vector<8x32xf32> to vector<8xf32>
    %93 = vector.shape_cast %92 : vector<8xf32> to vector<8x1xf32>
    %cst_43 = arith.constant 3.100000e+01 : f32
    %94 = vector.broadcast %cst_43 : f32 to vector<8x1xf32>
    %95 = arith.divf %93, %94 : vector<8x1xf32>
    %96 = vector.broadcast %88 : vector<8x1xf32> to vector<8x32xf32>
    %97 = arith.subf %80, %96 : vector<8x32xf32>
    %98 = vector.broadcast %82 : vector<1x32xf32> to vector<8x32xf32>
    %99 = arith.mulf %98, %97 : vector<8x32xf32>
    %cst_44 = arith.constant 9.99999997E-7 : f32
    %100 = vector.broadcast %cst_44 : f32 to vector<8x1xf32>
    %101 = arith.addf %95, %100 : vector<8x1xf32>
    %102 = math.sqrt %101 : vector<8x1xf32>
    %103 = vector.broadcast %102 : vector<8x1xf32> to vector<8x32xf32>
    %104 = arith.divf %99, %103 : vector<8x32xf32>
    %105 = vector.broadcast %84 : vector<1x32xf32> to vector<8x32xf32>
    %106 = arith.addf %104, %105 : vector<8x32xf32>
    %107 = arith.truncf %106 : vector<8x32xf32> to vector<8x32xbf16>
    %c0_45 = arith.constant 0 : index
    %c0_46 = arith.constant 0 : index
    %c0_47 = arith.constant 0 : index
    %108 = vector.load %arg12[%c0_45, %c0_46, %c0_47] : memref<1x32x64xbf16, #tpu.memory_space<vmem>>, vector<1x32x64xbf16>
    %109 = vector.shape_cast %108 : vector<1x32x64xbf16> to vector<32x64xbf16>
    %cst_48 = arith.constant dense<0.000000e+00> : vector<8x64xf32>
    %110 = tpu.matmul %107, %109, %cst_48 {dimension_numbers = #tpu.dot_dimension_numbers<[1], [0], [0], [1], [0, 0, 1, 1], [], []>} : vector<8x32xbf16>, vector<32x64xbf16>, vector<8x64xf32> -> vector<8x64xf32>
    %c0_49 = arith.constant 0 : index
    %c0_50 = arith.constant 0 : index
    %c0_51 = arith.constant 0 : index
    %111 = vector.load %arg13[%c0_49, %c0_50, %c0_51] : memref<1x1x64xf32, #tpu.memory_space<vmem>>, vector<1x1x64xf32>
    %112 = vector.shape_cast %111 : vector<1x1x64xf32> to vector<1x64xf32>
    %113 = vector.broadcast %112 : vector<1x64xf32> to vector<8x64xf32>
    %114 = arith.addf %110, %113 : vector<8x64xf32>
    %cst_52 = arith.constant 0.000000e+00 : f32
    %115 = vector.broadcast %cst_52 : f32 to vector<8x64xf32>
    %116 = arith.maximumf %114, %115 : vector<8x64xf32>
    %117 = arith.truncf %116 : vector<8x64xf32> to vector<8x64xbf16>
    %c0_53 = arith.constant 0 : index
    %c0_54 = arith.constant 0 : index
    %c0_55 = arith.constant 0 : index
    %118 = vector.load %arg14[%c0_53, %c0_54, %c0_55] : memref<1x64x32xbf16, #tpu.memory_space<vmem>>, vector<1x64x32xbf16>
    %119 = vector.shape_cast %118 : vector<1x64x32xbf16> to vector<64x32xbf16>
    %cst_56 = arith.constant dense<0.000000e+00> : vector<8x32xf32>
    %120 = tpu.matmul %117, %119, %cst_56 {dimension_numbers = #tpu.dot_dimension_numbers<[1], [0], [0], [1], [0, 0, 1, 1], [], []>} : vector<8x64xbf16>, vector<64x32xbf16>, vector<8x32xf32> -> vector<8x32xf32>
    %c0_57 = arith.constant 0 : index
    %c0_58 = arith.constant 0 : index
    %c0_59 = arith.constant 0 : index
    %121 = vector.load %arg15[%c0_57, %c0_58, %c0_59] : memref<1x1x32xf32, #tpu.memory_space<vmem>>, vector<1x1x32xf32>
    %122 = vector.shape_cast %121 : vector<1x1x32xf32> to vector<1x32xf32>
    %123 = vector.broadcast %122 : vector<1x32xf32> to vector<8x32xf32>
    %124 = arith.addf %120, %123 : vector<8x32xf32>
    %125 = arith.addf %80, %124 : vector<8x32xf32>
    %c1_i32 = arith.constant 1 : i32
    %126 = arith.cmpi eq, %arg1, %c1_i32 : i32
    %127 = arith.extui %126 : i1 to i32
    %c0_i32_60 = arith.constant 0 : i32
    %128 = arith.cmpi ne, %127, %c0_i32_60 : i32
    scf.if %128 {
      %c0_63 = arith.constant 0 : index
      %c0_64 = arith.constant 0 : index
      %132 = vector.load %arg16[%c0_63, %c0_64] : memref<1x32xf32, #tpu.memory_space<vmem>>, vector<1x32xf32>
      %c0_65 = arith.constant 0 : index
      %c0_66 = arith.constant 0 : index
      %133 = vector.load %arg17[%c0_65, %c0_66] : memref<1x32xf32, #tpu.memory_space<vmem>>, vector<1x32xf32>
      %cst_67 = arith.constant dense<0.000000e+00> : vector<8xf32>
      %134 = vector.multi_reduction <add>, %125, %cst_67 [1] : vector<8x32xf32> to vector<8xf32>
      %135 = vector.shape_cast %134 : vector<8xf32> to vector<8x1xf32>
      %cst_68 = arith.constant 3.200000e+01 : f32
      %136 = vector.broadcast %cst_68 : f32 to vector<8x1xf32>
      %137 = arith.divf %135, %136 : vector<8x1xf32>
      %138 = vector.broadcast %137 : vector<8x1xf32> to vector<8x32xf32>
      %139 = arith.subf %125, %138 : vector<8x32xf32>
      %140 = arith.mulf %139, %139 : vector<8x32xf32>
      %cst_69 = arith.constant dense<0.000000e+00> : vector<8xf32>
      %141 = vector.multi_reduction <add>, %140, %cst_69 [1] : vector<8x32xf32> to vector<8xf32>
      %142 = vector.shape_cast %141 : vector<8xf32> to vector<8x1xf32>
      %cst_70 = arith.constant 3.100000e+01 : f32
      %143 = vector.broadcast %cst_70 : f32 to vector<8x1xf32>
      %144 = arith.divf %142, %143 : vector<8x1xf32>
      %145 = vector.broadcast %137 : vector<8x1xf32> to vector<8x32xf32>
      %146 = arith.subf %125, %145 : vector<8x32xf32>
      %147 = vector.broadcast %132 : vector<1x32xf32> to vector<8x32xf32>
      %148 = arith.mulf %147, %146 : vector<8x32xf32>
      %cst_71 = arith.constant 9.99999997E-7 : f32
      %149 = vector.broadcast %cst_71 : f32 to vector<8x1xf32>
      %150 = arith.addf %144, %149 : vector<8x1xf32>
      %151 = math.sqrt %150 : vector<8x1xf32>
      %152 = vector.broadcast %151 : vector<8x1xf32> to vector<8x32xf32>
      %153 = arith.divf %148, %152 : vector<8x32xf32>
      %154 = vector.broadcast %133 : vector<1x32xf32> to vector<8x32xf32>
      %155 = arith.addf %153, %154 : vector<8x32xf32>
      %c0_72 = arith.constant 0 : index
      %c0_73 = arith.constant 0 : index
      %c0_74 = arith.constant 0 : index
      %156 = vector.load %arg18[%c0_72, %c0_73, %c0_74] : memref<1x8x32xf32, #tpu.memory_space<vmem>>, vector<1x8x32xf32>
      %157 = vector.shape_cast %156 : vector<1x8x32xf32> to vector<8x32xf32>
      %158 = vector.shape_cast %155 : vector<8x32xf32> to vector<1x8x32xf32>
      tpu.vector_store %arg18[%c0_72, %c0_73, %c0_74], %158 {strides = array<i32>} : memref<1x8x32xf32, #tpu.memory_space<vmem>>, vector<1x8x32xf32>,
    } else {
    }
    %c1_i32_61 = arith.constant 1 : i32
    %129 = arith.cmpi slt, %arg1, %c1_i32_61 : i32
    %130 = arith.extui %129 : i1 to i32
    %c0_i32_62 = arith.constant 0 : i32
    %131 = arith.cmpi ne, %130, %c0_i32_62 : i32
    scf.if %131 {
      %c0_63 = arith.constant 0 : index
      %c0_64 = arith.constant 0 : index
      %c0_65 = arith.constant 0 : index
      %132 = vector.load %arg18[%c0_63, %c0_64, %c0_65] : memref<1x8x32xf32, #tpu.memory_space<vmem>>, vector<1x8x32xf32>
      %133 = vector.shape_cast %132 : vector<1x8x32xf32> to vector<8x32xf32>
      %134 = vector.shape_cast %125 : vector<8x32xf32> to vector<1x8x32xf32>
      tpu.vector_store %arg18[%c0_63, %c0_64, %c0_65], %134 {strides = array<i32>} : memref<1x8x32xf32, #tpu.memory_space<vmem>>, vector<1x8x32xf32>,
    } else {
    }
    return
  }
  func.func @transform_0(%arg0: i32, %arg1: i32) -> (i32, i32, i32) {
    %c0_i32 = arith.constant 0 : i32
    %c0_i32_0 = arith.constant 0 : i32
    %c0_i32_1 = arith.constant 0 : i32
    return %arg0, %c0_i32, %c0_i32_0 : i32, i32, i32
  }
  func.func @transform_1(%arg0: i32, %arg1: i32) -> (i32, i32, i32) {
    %c0_i32 = arith.constant 0 : i32
    %c0_i32_0 = arith.constant 0 : i32
    %c0_i32_1 = arith.constant 0 : i32
    return %arg0, %c0_i32, %c0_i32_0 : i32, i32, i32
  }
  func.func @transform_2(%arg0: i32, %arg1: i32) -> (i32, i32, i32) {
    %c0_i32 = arith.constant 0 : i32
    %c0_i32_0 = arith.constant 0 : i32
    %c0_i32_1 = arith.constant 0 : i32
    return %arg1, %c0_i32, %c0_i32_0 : i32, i32, i32
  }
  func.func @transform_3(%arg0: i32, %arg1: i32) -> (i32, i32, i32) {
    %c0_i32 = arith.constant 0 : i32
    %c0_i32_0 = arith.constant 0 : i32
    %c0_i32_1 = arith.constant 0 : i32
    return %arg1, %c0_i32, %c0_i32_0 : i32, i32, i32
  }
  func.func @transform_4(%arg0: i32, %arg1: i32) -> (i32, i32, i32) {
    %c0_i32 = arith.constant 0 : i32
    %c0_i32_0 = arith.constant 0 : i32
    %c0_i32_1 = arith.constant 0 : i32
    return %arg1, %c0_i32, %c0_i32_0 : i32, i32, i32
  }
  func.func @transform_5(%arg0: i32, %arg1: i32) -> (i32, i32, i32) {
    %c0_i32 = arith.constant 0 : i32
    %c0_i32_0 = arith.constant 0 : i32
    %c0_i32_1 = arith.constant 0 : i32
    return %arg1, %c0_i32, %c0_i32_0 : i32, i32, i32
  }
  func.func @transform_6(%arg0: i32, %arg1: i32) -> (i32, i32, i32) {
    %c0_i32 = arith.constant 0 : i32
    %c0_i32_0 = arith.constant 0 : i32
    %c0_i32_1 = arith.constant 0 : i32
    return %arg1, %c0_i32, %c0_i32_0 : i32, i32, i32
  }
  func.func @transform_7(%arg0: i32, %arg1: i32) -> (i32, i32, i32) {
    %c0_i32 = arith.constant 0 : i32
    %c0_i32_0 = arith.constant 0 : i32
    %c0_i32_1 = arith.constant 0 : i32
    return %arg1, %c0_i32, %c0_i32_0 : i32, i32, i32
  }
  func.func @transform_8(%arg0: i32, %arg1: i32) -> (i32, i32, i32) {
    %c0_i32 = arith.constant 0 : i32
    %c0_i32_0 = arith.constant 0 : i32
    %c0_i32_1 = arith.constant 0 : i32
    return %arg1, %c0_i32, %c0_i32_0 : i32, i32, i32
  }
  func.func @transform_9(%arg0: i32, %arg1: i32) -> (i32, i32, i32) {
    %c0_i32 = arith.constant 0 : i32
    %c0_i32_0 = arith.constant 0 : i32
    %c0_i32_1 = arith.constant 0 : i32
    return %arg1, %c0_i32, %c0_i32_0 : i32, i32, i32
  }
  func.func @transform_10(%arg0: i32, %arg1: i32) -> (i32, i32, i32) {
    %c0_i32 = arith.constant 0 : i32
    %c0_i32_0 = arith.constant 0 : i32
    %c0_i32_1 = arith.constant 0 : i32
    return %arg1, %c0_i32, %c0_i32_0 : i32, i32, i32
  }
  func.func @transform_11(%arg0: i32, %arg1: i32) -> (i32, i32, i32) {
    %c0_i32 = arith.constant 0 : i32
    %c0_i32_0 = arith.constant 0 : i32
    %c0_i32_1 = arith.constant 0 : i32
    return %arg1, %c0_i32, %c0_i32_0 : i32, i32, i32
  }
  func.func @transform_12(%arg0: i32, %arg1: i32) -> (i32, i32, i32) {
    %c0_i32 = arith.constant 0 : i32
    %c0_i32_0 = arith.constant 0 : i32
    %c0_i32_1 = arith.constant 0 : i32
    return %arg1, %c0_i32, %c0_i32_0 : i32, i32, i32
  }
  func.func @transform_13(%arg0: i32, %arg1: i32) -> (i32, i32, i32) {
    %c0_i32 = arith.constant 0 : i32
    %c0_i32_0 = arith.constant 0 : i32
    %c0_i32_1 = arith.constant 0 : i32
    return %arg1, %c0_i32, %c0_i32_0 : i32, i32, i32
  }
  func.func @transform_14(%arg0: i32, %arg1: i32) -> (i32, i32) {
    %c0_i32 = arith.constant 0 : i32
    %c0_i32_0 = arith.constant 0 : i32
    %c0_i32_1 = arith.constant 0 : i32
    return %c0_i32, %c0_i32_0 : i32, i32
  }
  func.func @transform_15(%arg0: i32, %arg1: i32) -> (i32, i32) {
    %c0_i32 = arith.constant 0 : i32
    %c0_i32_0 = arith.constant 0 : i32
    %c0_i32_1 = arith.constant 0 : i32
    return %c0_i32, %c0_i32_0 : i32, i32
  }
  func.func @transform_16(%arg0: i32, %arg1: i32) -> (i32, i32, i32) {
    %c0_i32 = arith.constant 0 : i32
    %c0_i32_0 = arith.constant 0 : i32
    %c0_i32_1 = arith.constant 0 : i32
    return %arg0, %c0_i32, %c0_i32_0 : i32, i32, i32
  }
}

</mosaic_0001>

<bundles_post_ra>
// kernel: tpu_custom_call.1
= control target key start
LH: loop header
LB: loop body
LE: loop exit
PB: predicated region body
PF: predicated region fallthrough
CT: control target
= control target key end

     0   :  { %s3809_s0 = inlined_call_operand.hbm [shape: f32[2,8,32], index: 0, kind: input, shape index: {}]   ;;  %s3810_s1 = inlined_call_operand.hbm [shape: bf16[2,8,8], index: 1, kind: input, shape index: {}]   ;;  %s3811_s2 = inlined_call_operand.vmem [shape: f32[2,1,32], index: 2, kind: input, shape index: {}]   ;;  %s3812_s3 = inlined_call_operand.vmem [shape: f32[2,1,32], index: 3, kind: input, shape index: {}]   ;;  %s3813_s4 = inlined_call_operand.vmem [shape: bf16[2,32,96], index: 4, kind: input, shape index: {}]   ;;  %s3814_s5 = inlined_call_operand.vmem [shape: f32[2,1,96], index: 5, kind: input, shape index: {}]   ;;  %s3815_s6 = inlined_call_operand.vmem [shape: bf16[2,32,32], index: 6, kind: input, shape index: {}]   ;;  %s3816_s7 = inlined_call_operand.vmem [shape: f32[2,1,32], index: 7, kind: input, shape index: {}]   ;;  %s3817_s8 = inlined_call_operand.vmem [shape: f32[2,1,32], index: 8, kind: input, shape index: {}]   ;;  %s3818_s9 = inlined_call_operand.vmem [shape: f32[2,1,32], index: 9, kind: input, shape index: {}]   ;;  %s3819_s10 = inlined_call_operand.vmem [shape: bf16[2,32,64], index: 10, kind: input, shape index: {}]   ;;  %s3820_s11 = inlined_call_operand.hbm [shape: f32[2,1,64], index: 11, kind: input, shape index: {}]   ;;  %s3821_s12 = inlined_call_operand.vmem [shape: bf16[2,64,32], index: 12, kind: input, shape index: {}]   ;;  %s3822_s13 = inlined_call_operand.vmem [shape: f32[2,1,32], index: 13, kind: input, shape index: {}]   ;;  %s3823_s14 = inlined_call_operand.vmem [shape: f32[1,32], index: 14, kind: input, shape index: {}]   ;;  %s3824_s15 = inlined_call_operand.vmem [shape: f32[1,32], index: 15, kind: input, shape index: {}]   ;;  %s3825_s16 = inlined_call_operand.hbm [shape: f32[2,8,32], index: 16, kind: output, shape index: {}]  }
   0x1   :  { %3850 = sst [smem:[#allocation30_spill]] %s3809_s0 }
   0x2   :  { %3851 = sst [smem:[#allocation31_spill]] %s3810_s1 }
   0x3   :  { %3852 = sst [smem:[#allocation32_spill]] %s3813_s4 }
   0x4   :  { %3853 = sst [smem:[#allocation33_spill]] %s3815_s6 }
   0x5   :  { %3854 = sst [smem:[#allocation34_spill]] %s3816_s7 }
   0x6   :  { %3855 = sst [smem:[#allocation35_spill]] %s3817_s8 }
   0x7   :  { %3856 = sst [smem:[#allocation36_spill]] %s3818_s9 }
   0x8   :  { %3857 = sst [smem:[#allocation37_spill]] %s3819_s10 }
   0x9   :  { %3858 = sst [smem:[#allocation38_spill]] %s3820_s11 }
   0xa   :  { %3859 = sst [smem:[#allocation39_spill]] %s3821_s12 }
   0xb   :  { %3860 = sst [smem:[#allocation40_spill]] %s3822_s13 }
   0xc   :  { %3861 = sst [smem:[#allocation41_spill]] %s3823_s14 }
   0xd   :  { %3862 = sst [smem:[#allocation42_spill]] %s3824_s15 }
   0xe   :  { %3863 = sst [smem:[#allocation43_spill]] %s3825_s16 }
   0xf   :  { %21 = vsyncpa [#allocation3], 0 }
  0x10   :  { %23 = vsyncpa [#allocation3 + $0x1], 0 }
  0x11   :  { %24 = vsyncpa [#allocation6], 0 }
  0x12   :  { %26 = vsyncpa [#allocation6 + $0x1], 0 }
  0x13   :  { %27 = vsyncpa [#allocation4], 0 }
  0x14   :  { %29 = vsyncpa [#allocation4 + $0x1], 0  ;;  %s3157_s21 = smov 0   ;;  %s3159_s22 = smov 0  }
  0x15   :  { %s3161_s23 = smov 0   ;;  %s3163_s24 = smov 0  }
  0x16   :  { %s3165_s25 = smov 0   ;;  %s3167_s26 = smov 0  }
  0x17   :  { %s3169_s27 = smov 0   ;;  %s3171_s28 = smov 0  }
  0x18   :  { %s3173_s29 = smov 0   ;;  %s3175_s30 = smov 0  }
  0x19   :  { %s3177_s0 = smov 0  }
  0x1a LB: > { %3864 = sst [smem:[#allocation13_spill]] %s3018_s22  ;;  %s3213_s17 = sadd.s32 4294967295, %s3054_s0   ;;  %s3054_s0 = sphi %s3177_s0, %s35_s0   ;;  %s3050_s30 = sphi %s3175_s30, %s3938_s30   ;;  %s3046_s29 = sphi %s3173_s29, %s3937_s29   ;;  %s3042_s28 = sphi %s3171_s28, %s3936_s28   ;;  %s3038_s27 = sphi %s3169_s27, %s3935_s27   ;;  %s3034_s26 = sphi %s3167_s26, %s3934_s26   ;;  %s3030_s25 = sphi %s3165_s25, %s3933_s25   ;;  %s3026_s24 = sphi %s3163_s24, %s3932_s24   ;;  %s3022_s23 = sphi %s3161_s23, %s3931_s23   ;;  %s3018_s22 = sphi %s3159_s22, %s3930_s22   ;;  %s3014_s21 = sphi %s3157_s21, %s3929_s21  }
  0x1b   : > { %3865 = sst [smem:[#allocation14_spill]] %s3022_s23  ;;  %s2487_s18 = sadd.s32 4294967294, %s3054_s0  }
  0x1c   : > { %3866 = sst [smem:[#allocation15_spill]] %s3026_s24  ;;  %p61_p0 = scmp.ne.s32.totalorder %s3034_s26, %s3030_s25 }
  0x1d   : > { %3867 = sst [smem:[#allocation16_spill]] %s3030_s25  ;;  %p3834_p1 = scmp.eq.s32.totalorder %s3054_s0, 0 }
  0x1e   : > { %3868 = sst [smem:[#allocation17_spill]] %s3034_s26  ;;  %p67_p2 = scmp.ne.s32.totalorder %s3030_s25, %s3026_s24 }
  0x1f   : > { %3869 = sst [smem:[#allocation18_spill]] %s3042_s28  ;;  %p3833_p3 = scmp.eq.s32.totalorder %s3213_s17, 0 }
  0x20   : > { %3870 = sst [smem:[#allocation19_spill]] %s3046_s29  ;;  %p63_p4 = por %p3834_p1, %p61_p0 }
  0x21   : > { %3871 = sst [smem:[#allocation20_spill]] %s3050_s30  ;;  %p471_p5 = scmp.eq.s32.totalorder %s3213_s17, 3 }
  0x22   : > { %3872 = sst [smem:[#allocation21_spill]] %s3054_s0  ;;  %p3229_p6 = por %p3833_p3, %p67_p2 }
  0x23   : > { %p477_p7 = scmp.eq.s32.totalorder %s2487_s18, 3  ;;  %p3233_p8 = por %p471_p5, %p61_p0 }
  0x24   : > { %s3873_s16 = scalar_select %p3229_p6, 1, 0 }
  0x25   : > { %s3874_s28 = scalar_select %p3233_p8, 1, 0 }
  0x26   : > { %p3237_p9 = por %p477_p7, %p67_p2  ;;  %p3832_p10 = scmp.lt.s32.totalorder %s3054_s0, 4 }
  0x27   : > { %3875 = sst [smem:[#allocation22_spill]] %s3874_s28  ;;  %s3243_s19 = sand.u32 1, %s3034_s26  }
  0x28   : > { %s3876_s20 = scalar_select %p3237_p9, 1, 0 }
  0x29   : > { %s521_s24 = sand.u32 1, %s3054_s0   ;;  %p3248_p11 = pnand %p3832_p10, %p63_p4 }
  0x2a   : > { %3877 = sst [smem:[#allocation23_spill]] %s3876_s20  ;;  %s2492_s18 = sshll.u32 %s3243_s19, 2 }
  0x2b   : > { %s2493_s14 = sshll.u32 %s3050_s30, 6  ;;  %s3879_s1 = sld [smem:[#allocation31_spill]] }
  0x2c   : > { %s525_s20 = scalar_lea.vmem [#allocation5], %s2492_s18  ;;  %s3262_s9 = scalar_lea.sflag [#allocation6], %s521_s24 }
  0x2d   : > { %s532_s10 = sshll.u32 %s525_s20, 4  ;;  %p2836_p0 = pneg %p3248_p11  ;;  %s3259_s10 = int_to_ptr.vmem [resolvable:$true] %s532_s10 }
  0x31   : > { %s3257_s13 = scalar_lea.hbm %s3879_s1, %s2493_s14  ;;  %s2839_s28 = scalar_lea.hbm %s3879_s1, 128 }
  0x32   : > { %s2834_s8 = scalar_lea.hbm %s3257_s13, 64  ;;  %p2840_p5 = scmp.lt.u32.totalorder %s3257_s13, %s3879_s1 }
  0x33   : > { %p2835_p13 = scmp.ne.s32.totalorder %s3257_s13, %s2834_s8  ;;  %p2841_p7 = scmp.lt.u32.totalorder %s2839_s28, %s2834_s8 }
  0x34   : > { %p2843_p3 = scmp.lt.u32.totalorder %s2834_s8, %s3257_s13 }
  0x35   : > { %p2837_p2 = pnand %p2836_p0, %p2835_p13  ;;  %p2842_p10 = por %p2841_p7, %p2840_p5 }
  0x37   : > { %p2838_p4 = pneg %p2837_p2  ;;  %p2844_p1 = por %p2843_p3, %p2842_p10 }
  0x39   : > { %p2845_p12 = pnand %p2844_p1, %p2838_p4 }
  0x3b   : > { %2848 = shalt.err (!%p2845_p12)
}
  0x3c   : > { %s2849_s24 = scalar_lea.vmem %s3259_s10, 64  ;;  %s3056_s20 = smov [#allocation5]  }
  0x3d   : > { %p2850_p13 = scmp.ne.s32.totalorder %s3259_s10, %s2849_s24  ;;  %s2854_s12 = sshll.u32 %s3056_s20, 4  ;;  %s2855_s12 = int_to_ptr.vmem [resolvable:$false] %s2854_s12 }
  0x3e   : > { %s2856_s7 = scalar_lea.vmem %s2855_s12, 128  ;;  %p2857_p8 = scmp.lt.s32.totalorder %s3259_s10, %s2855_s12 }
  0x3f   : > { %p2852_p2 = pnand %p2850_p13, %p2836_p0  ;;  %p2858_p5 = scmp.lt.s32.totalorder %s2856_s7, %s2849_s24 }
  0x41   : > { %p2853_p9 = pneg %p2852_p2  ;;  %p2859_p7 = por %p2858_p5, %p2857_p8 }
  0x43   : > { %p2860_p3 = pnand %p2859_p7, %p2853_p9 }
  0x45   : > { %2863 = shalt.err (!%p2860_p3)
}
  0x46   : > { %2686 = dma.hbm_to_vmem [thread:$0]  (!%p3248_p11), %s3257_s13, 64, %s3259_s10, %s3262_s9  }
  0x47   : > { %p628_p1 = scmp.lt.s32.totalorder %s3054_s0, 5  ;;  %p3880_p10 = scmp.ge.s32.totalorder %s3054_s0, 1 }
  0x48   : > { %s2490_s14 = sshll.u32 %s3243_s19, 3  ;;  %s2491_s28 = sshll.u32 %s3050_s30, 7 }
  0x49   : > { %p3293_p12 = pnand %p3880_p10, %p628_p1  ;;  %s3882_s20 = sld [smem:[#allocation30_spill]] }
  0x4a   : > { %s507_s7 = scalar_lea.vmem [#allocation2], %s2490_s14  ;;  %s504_s10 = scalar_lea.sflag [#allocation3], %s3243_s19 }
  0x4b   : > { %s3881_s8 = scalar_select %p3293_p12, 1, 0 }
  0x4c   : > { %s514_s1 = sshll.u32 %s507_s7, 4  ;;  %s515_s1 = int_to_ptr.vmem [resolvable:$true] %s514_s1 }
  0x4f   : > { %s3302_s12 = scalar_lea.hbm %s3882_s20, %s2491_s28  ;;  %s2869_s18 = scalar_lea.hbm %s3882_s20, 256 }
  0x50   : > { %s2864_s13 = scalar_lea.hbm %s3302_s12, 128  ;;  %p2870_p13 = scmp.lt.u32.totalorder %s3302_s12, %s3882_s20 }
  0x51   : > { %p2865_p8 = scmp.ne.s32.totalorder %s3302_s12, %s2864_s13  ;;  %p2871_p2 = scmp.lt.u32.totalorder %s2869_s18, %s2864_s13 }
  0x52   : > { %p2873_p7 = scmp.lt.u32.totalorder %s2864_s13, %s3302_s12 }
  0x53   : > { %p2867_p9 = pnand %p2865_p8, %p2836_p0  ;;  %p2872_p5 = por %p2871_p2, %p2870_p13 }
  0x55   : > { %p2868_p4 = pneg %p2867_p9  ;;  %p2874_p3 = por %p2873_p7, %p2872_p5 }
  0x57   : > { %p2875_p1 = pnand %p2874_p3, %p2868_p4 }
  0x59   : > { %2878 = shalt.err (!%p2875_p1)
}
  0x5a   : > { %s2879_s19 = scalar_lea.vmem %s515_s1, 128  ;;  %s3057_s14 = smov [#allocation2]  }
  0x5b   : > { %p2880_p10 = scmp.ne.s32.totalorder %s515_s1, %s2879_s19  ;;  %s2884_s4 = sshll.u32 %s3057_s14, 4  ;;  %s2885_s4 = int_to_ptr.vmem [resolvable:$false] %s2884_s4 }
  0x5c   : > { %s2886_s6 = scalar_lea.vmem %s2885_s4, 256  ;;  %p2887_p6 = scmp.lt.s32.totalorder %s515_s1, %s2885_s4 }
  0x5d   : > { %p2882_p8 = pnand %p2880_p10, %p2836_p0  ;;  %p2888_p12 = scmp.lt.s32.totalorder %s2886_s6, %s2879_s19 }
  0x5f   : > { %p2883_p9 = pneg %p2882_p8  ;;  %p2889_p2 = por %p2888_p12, %p2887_p6 }
  0x61   : > { %p2890_p13 = pnand %p2889_p2, %p2883_p9 }
  0x63   : > { %2893 = shalt.err (!%p2890_p13)
}
  0x64   : > { %2683 = dma.hbm_to_vmem [thread:$0]  (!%p3248_p11), %s3302_s12, 128, %s515_s1, %s504_s10  }
  0x65   : > { %s44_s7 = sadd.s32 1, %s3046_s29  ;;  %s340_s15 = sadd.s32 1, %s3022_s23 }
  0x66   : > { %p45_p6 = scmp.ge.s32.totalorder %s44_s7, 2  ;;  %p347_p0 = scmp.ne.s32.totalorder %s3022_s23, %s3018_s22 }
  0x67   : > { %p353_p12 = scmp.ne.s32.totalorder %s3018_s22, %s3014_s21  ;;  %s3884_s13 = sadd.s32 1, %s3050_s30 }
  0x68   : > { %s3940_s7 = smov (%p45_p6, %s44_s7), 0  ;;  %s3942_s13 = smov (!%p45_p6, %s3884_s13), %s3050_s30 }
  0x69   : > { %3883 = sst [smem:[#allocation24_spill]] %s3940_s7  ;;  %s337_s18 = ssub.s32 %s3046_s29, %s3940_s7 }
  0x6a   : > { %p3885_p4 = scmp.eq.s32.totalorder %s3054_s0, 0  ;;  %p49_p11 = scmp.ge.s32.totalorder %s3942_s13, 2 }
  0x6b   : > { %p338_p7 = scmp.eq.s32.totalorder %s337_s18, 0  ;;  %p3887_p3 = scmp.eq.s32.totalorder %s3213_s17, 0 }
  0x6c   : > { %p3339_p5 = por %p347_p0, %p3885_p4  ;;  %s601_s21 = sand.u32 1, %s3022_s23  }
  0x6d   : > { %p3345_p1 = por %p353_p12, %p3887_p3  ;;  %s3944_s13 = smov (%p49_p11, %s3942_s13), 0 }
  0x6e   : > { %3889 = sst [smem:[#allocation25_spill]] %s3944_s13  ;;  %s51_s10 = ssub.s32 %s3050_s30, %s3944_s13 }
  0x6f   : > { %s3353_s12 = scalar_select %p338_p7, %s3022_s23, %s340_s15  }
  0x70   : > { %p52_p10 = scmp.eq.s32.totalorder %s51_s10, 0  ;;  %s2494_s24 = sshll.u32 %s3046_s29, 4 }
  0x71   : > { %3890 = sst [smem:[#allocation26_spill]] %s3353_s12  ;;  %s3891_s11 = sld [smem:[#allocation38_spill]] }
  0x72   : > { %s602_s6 = scalar_lea.vmem [#allocation7], %s601_s21  ;;  %s3892_s20 = sadd.s32 1, %s3034_s26 }
  0x73   : > { %s609_s18 = sshll.u32 %s602_s6, 4  ;;  %p3894_p8 = scmp.lt.s32.totalorder %s3054_s0, 4  ;;  %s3368_s18 = int_to_ptr.vmem [resolvable:$true] %s609_s18 }
  0x74   : > { %s3366_s7 = scalar_select %p52_p10, %s3034_s26, %s3892_s20  }
  0x75   : > { %p3374_p9 = pnand %p3894_p8, %p3339_p5 }
  0x76   : > { %3893 = sst [smem:[#allocation27_spill]] %s3366_s7 }
  0x77   : > { %s3361_s4 = scalar_lea.hbm %s3891_s11, %s2494_s24  ;;  %p2896_p13 = pneg %p3374_p9 }
  0x78   : > { %s2894_s10 = scalar_lea.hbm %s3361_s4, 16  ;;  %s2899_s24 = scalar_lea.hbm %s3891_s11, 32 }
  0x79   : > { %p2895_p2 = scmp.ne.s32.totalorder %s3361_s4, %s2894_s10  ;;  %p2900_p12 = scmp.lt.u32.totalorder %s3361_s4, %s3891_s11 }
  0x7a   : > { %p2901_p4 = scmp.lt.u32.totalorder %s2899_s24, %s2894_s10  ;;  %p2903_p11 = scmp.lt.u32.totalorder %s2894_s10, %s3361_s4 }
  0x7b   : > { %p2897_p6 = pnand %p2896_p13, %p2895_p2 }
  0x7c   : > { %p2902_p5 = por %p2901_p4, %p2900_p12 }
  0x7d   : > { %p2898_p0 = pneg %p2897_p6 }
  0x7e   : > { %p2904_p7 = por %p2903_p11, %p2902_p5 }
  0x80   : > { %p2905_p3 = pnand %p2904_p7, %p2898_p0 }
  0x82   : > { %2908 = shalt.err (!%p2905_p3)
}
  0x83   : > { %s2909_s14 = scalar_lea.vmem %s3368_s18, 16  ;;  %s3058_s6 = smov [#allocation7]  }
  0x84   : > { %p2910_p10 = scmp.ne.s32.totalorder %s3368_s18, %s2909_s14  ;;  %s2914_s20 = sshll.u32 %s3058_s6, 4  ;;  %s2915_s20 = int_to_ptr.vmem [resolvable:$false] %s2914_s20 }
  0x85   : > { %s2916_s21 = scalar_lea.vmem %s2915_s20, 32  ;;  %p2917_p6 = scmp.lt.s32.totalorder %s3368_s18, %s2915_s20 }
  0x86   : > { %p2912_p8 = pnand %p2910_p10, %p2896_p13  ;;  %p2918_p12 = scmp.lt.s32.totalorder %s2916_s21, %s2909_s14 }
  0x88   : > { %p2913_p2 = pneg %p2912_p8  ;;  %p2919_p4 = por %p2918_p12, %p2917_p6 }
  0x8a   : > { %p2920_p5 = pnand %p2919_p4, %p2913_p2 }
  0x8c   : > { %2923 = shalt.err (!%p2920_p5)
}
  0x8d   : > { %2689 = dma.hbm_to_vmem [thread:$0]  (!%p3374_p9), %s3361_s4, 16, %s3368_s18, %s3262_s9  }
  0x8e   : > { %p3896_p0 = scmp.ne.s32.totalorder %s3881_s8, 0 }
  0x90   : > { %632 = sbr.rel (%p3896_p0) target bundleno = 3269 (0xcc5), region = 84 }
  0x97   : > { %s3407_s10 = sand.u32 1, %s3030_s25   ;;  %p3897_p13 = scmp.ne.s32.totalorder %s3873_s16, 0 }
  0x98   : > { %s3839_s24 = sshll.u32 %s3407_s10, 3  ;;  %s635_s28 = scalar_lea.sflag [#allocation3], %s3407_s10 }
  0x99   : > { %s3413_s19 = scalar_lea.vmem [#allocation2], %s3839_s24 }
  0x9a   : > { %2997 = dma.done.wait (%p3897_p13), %s635_s28, 128  }
  0x9b   : > { %2999 = vsyncadd (%p3897_p13), %s635_s28, 4294967168  ;;  %s643_s9 = sand.u32 1, %s3213_s17   ;;  %s2497_s8 = sshll.u32 %s3407_s10, 2 }
  0x9c   : > { %s644_s4 = scalar_lea.sflag [#allocation6], %s643_s9  ;;  %s3421_s18 = scalar_lea.vmem [#allocation5], %s2497_s8 }
  0x9d   : > { %3001 = dma.done.wait (%p3897_p13), %s644_s4, 64  }
  0x9e   : > { %3003 = vsyncadd (%p3897_p13), %s644_s4, 4294967232  ;;  %s654_s15 = sand.u32 1, %s3018_s22  }
  0x9f   : > { %s3428_s14 = scalar_lea.vmem [#allocation7], %s654_s15 }
  0xa0   : > { %3898 = sst [smem:[#allocation28_spill]] %s3428_s14 }
  0xa1   : > { %3005 = dma.done.wait (%p3345_p1), %s644_s4, 16  }
  0xa2   : > { %3007 = vsyncadd (%p3345_p1), %s644_s4, 4294967280  ;;  %p754_p9 = scmp.lt.s32.totalorder %s3038_s27, 1  ;;  %s3899_s16 = sld [smem:[#allocation32_spill]] }
  0xa3   : > { %s3900_s29 = sld [smem:[#allocation33_spill]]  ;;  %s3903_s12 = sld [smem:[#allocation35_spill]] }
  0xa4   : > { %s3436_s17 = scalar_select %p754_p9, %s3038_s27, 1 }
  0xa5   : > { %s3904_s15 = sld [smem:[#allocation36_spill]]  ;;  %s3906_s14 = sld [smem:[#allocation40_spill]] }
  0xa6   : > { %s2554_s9 = sshll.u32 %s3436_s17, 4  ;;  %s2557_s30 = sshll.u32 %s3436_s17, 5 }
  0xa7   : > { %s3907_s1 = sld [smem:[#allocation39_spill]]  ;;  %p2507_p1 = scmp.ne.s32.totalorder %s3038_s27, 0 }
  0xa8   : > { %s3454_s11 = scalar_lea.vmem %s3899_s16, %s2554_s9  ;;  %s3905_s16 = sld [smem:[#allocation37_spill]]  ;;  %v800_v0 = vld [vmem:[%s3413_s19] sm:$0xff] (!%p2507_p1)  ;;  %vm801_vm0 = vcmask (!%p2507_p1), 261120  }
  0xa9   : > { %s3459_s7 = scalar_lea.vmem %s3900_s29, %s2554_s9  ;;  %s778_s23 = scalar_lea.vmem %s3903_s12, %s3436_s17 }
  0xaa   : > { %3901 = sst [smem:[#allocation29_spill]] %s3459_s7  ;;  %s3908_s12 = sshll.u32 %s3407_s10, 3 }
  0xab   : > { %s781_s22 = scalar_lea.vmem %s3904_s15, %s3436_s17  ;;  %s794_s7 = scalar_lea.vmem %s3906_s14, %s3436_s17 }
  0xac   : > { %s3490_s28 = scalar_lea.vmem [#allocation8], %s3908_s12  ;;  %799 = sbr.rel (%p2507_p1) target bundleno = 179 (0xb3), region = 100 }
  0xad   : > { %s3486_s20 = scalar_lea.vmem %s3907_s1, %s2557_s30  ;;  %802 = vst.msk [vmem:[%s3490_s28] sm:$0xff] (!%p2507_p1), %vm801_vm0, %v800_v0 }
  0xae   : > { %s3476_s0 = scalar_lea.vmem %s3905_s16, %s2554_s9 }
  0xb3 PF: > { %vm808_vm1 = vcmask 261120   ;;  %v2796_v8 = vld [vmem:[%s3454_s11] sm:$0xff]   ;;  %v3059_v9 = vmov 0.0   ;;  %vm3060_vm2 = vmmov 0   ;;  %v2797_v10 = vld [vmem:[%s3454_s11 + $0x8] sm:$0xff]   ;;  %s3909_s14 = scalar_lea.vmem %s3811_s2, %s3436_s17  ;;  %s3910_s21 = scalar_lea.vmem %s3812_s3, %s3436_s17  ;;  %v927_v37 = vlaneseq }
  0xb4   : > { %v3496_v1 = vld [vmem:[%s3490_s28] sm:$0xff]  ;;  %2588 = vmatprep.subr.bf16.mxu0 %v3059_v9  ;;  %2592 = vmatprep.mubr.msk.bf16.mxu0 %vm3060_vm2, %v3059_v9  ;;  %s3911_s24 = scalar_lea.vmem %s3814_s5, %s3436_s17  ;;  %s3061_s6 = smov 104   ;;  %v3065_v35 = vmov 1983009808   ;;  %v3066_v41 = vmov 1934713408  }
  0xb5   : > { %v809_v2 = vsel %vm808_vm1, %v3496_v1, 0.0  ;;  %2589 = vmatpush3.bf16.msra.mxu0 %v2796_v8  ;;  %2596 = vmatprep.subr.bf16.mxu1 %v3059_v9  ;;  %v2508_v19 = vld [vmem:[%s3909_s14] ss:$0 sm:$0xff]  ;;  %s3062_s16 = smov 120   ;;  %s3063_s30 = smov 112   ;;  %v925_v36 = vunpack.c.l.s4 %v3065_v35  ;;  %v928_v39 = vshrl.u32 %v927_v37, 7  ;;  %v957_v42 = vunpack.c.l.s4 %v3066_v41 }
  0xb6   : > { %810 = vadd.xlane.f32.xlu0 %v809_v2  ;;  %2590 = vmatprep.subr.bf16.mxu0 %v3059_v9  ;;  %v2509_v22 = vld [vmem:[%s3910_s21] ss:$0 sm:$0xff]  ;;  %s3064_s29 = smov 96   ;;  %vm1366_vm5 = vcmask 64512   ;;  %vm1602_vm6 = vcmask 1043456   ;;  %s3912_s13 = sld [smem:[#allocation29_spill]] }
  0xb7   : > { %2598 = vmatprep.mubr.msk.bf16.mxu1 %vm3060_vm2, %v3059_v9  ;;  %v2510_v26 = vld [vmem:[%s3911_s24] ss:$0 sm:$0xff]  ;;  %v926_v38 = vunpack.c.0.s8 %v925_v36  ;;  %v958_v49 = vunpack.c.0.s8 %v957_v42  ;;  %s3068_s26 = smov 16   ;;  %s3069_s25 = smov 8   ;;  %vm1933_vm7 = vcmask 130048   ;;  %vm1935_vm8 = vcmask 195584  }
  0xb8   : > { %s3070_s1 = smov 24   ;;  %s3913_s19 = sld [smem:[#allocation34_spill]]  ;;  %vm2149_vm11 = vcmask 523264  }
  0xb9   : > { %2591 = vmatpush3.bf16.msra.mxu0 %v2797_v10  ;;  %v3549_v45 = vsub.s32 %v926_v38, %v928_v39  ;;  %v3559_v55 = vsub.s32 %v958_v49, %v928_v39  ;;  %p2546_p11 = scmp.ne.s32.totalorder %s3038_s27, 1 }
  0xba   : > { %2602 = vmatprep.subr.bf16.mxu0 %v3059_v9 }
  0xbe   : > { %s3914_s14 = scalar_lea.vmem %s3913_s19, %s3436_s17 }
 0x143   : > { %v811_v3 = vpop.xlane.xlu0 %810 }
 0x144   : > { %v813_v4 = vmul.f32 0.03125, %v811_v3 }
 0x146   : > { %v814_v5 = vsub.f32 %v3496_v1, %v813_v4 }
 0x148   : > { %v815_v6 = vmul.f32 %v814_v5, %v814_v5  ;;  %v827_v20 = vmul.f32 %v2508_v19, %v814_v5 }
 0x14a   : > { %v816_v7 = vsel %vm808_vm1, %v815_v6, 0.0 }
 0x14b   : > { %817 = vadd.xlane.f32.xlu0 %v816_v7 }
 0x1d8   : > { %v818_v11 = vpop.xlane.xlu0 %817 }
 0x1d9   : > { %v820_v12 = vmul.f32 0.032258064, %v818_v11 }
 0x1db   : > { %v828_v13 = vadd.f32 1e-06, %v820_v12 }
 0x1dd   : > { %2806 = vrsqrt.f32 %v828_v13  ;;  %vm831_vm3 = vcmp.eq.f32.partialorder %v828_v13, inf  ;;  %v834_v16 = vand.u32 2147483648, %v828_v13  ;;  %vm833_vm4 = vcmp.eq.f32.partialorder %v828_v13, 0.0 }
 0x1e7   : > { %v2807_v14 = vpop.eup %2806 }
 0x1e8   : > { %v830_v15 = vmul.f32 %v2807_v14, %v828_v13 }
 0x1ea   : > { %v832_v17 = vsel %vm831_vm3, %v828_v13, %v830_v15 }
 0x1eb   : > { %v835_v18 = vsel %vm833_vm4, %v834_v16, %v832_v17 }
 0x1ec   : > { %2808 = vrcp.f32 %v835_v18 }
 0x1f6   : > { %v2809_v21 = vpop.eup %2808 }
 0x1f7   : > { %v837_v23 = vmul.f32 %v2809_v21, %v827_v20 }
 0x1f9   : > { %v844_v24 = vadd.f32 %v2509_v22, %v837_v23 }
 0x1fb   : > { %v845_v25 = vpack.c.bf16 %v844_v24, %v844_v24 }
 0x1fd   : > { %2593 = vmatmul.mubr.msk.bf16.vlgmr.msra.gmra.mrb[0].mxu0 %vm808_vm1, %v845_v25 }
 0x1fe   : > { %2604 = vmatprep.mubr.msk.bf16.mxu0 %vm3060_vm2, %v3059_v9 }
 0x2d0   : > { %v906_v27 = vpop.f32.mrb[0].mxu0 }
 0x2d1   : > { %v3530_v28 = vadd.f32 %v2510_v26, %v906_v27  ;;  %v2594_v29 = vpop.f32.mrb[1].mxu0 }
 0x2d2   : > { %v909_v30 = vpop.f32.mrb[2].mxu0 }
 0x2d3   : > { %919 = vrot.lane.b32.xlu0 %v3530_v28, %s3061_s6  ;;  %913 = vrot.lane.b32.xlu1 %v3530_v28, %s3062_s16  ;;  %v2595_v31 = vpop.f32.mrb[3].mxu0 }
 0x2d7   : > { %916 = vrot.lane.b32.xlu1 %v3530_v28, %s3063_s30 }
 0x2db   : > { %1062 = vrot.lane.b32.xlu1 %v3530_v28, %s3064_s29 }
 0x345   : > { %v3536_v32 = vpop.permute.xlu1 %913  ;;  %v3542_v34 = vpop.permute.xlu0 %919 }
 0x346   : > { %1064 = vrot.lane.b32.xlu1 %v3536_v32, %s3064_s29  ;;  %v938_v46 = vcombine.low %v3536_v32, %v3542_v34  ;;  %v939_v47 = vcombine.high %v3536_v32, %v3542_v34 }
 0x348   : > { %v946_v52 = vrot.slane %v938_v46, %v3549_v45  ;;  %v953_v53 = vrot.slane %v939_v47, %v3549_v45 }
 0x349   : > { %v3539_v33 = vpop.permute.xlu1 %916 }
 0x34a   : > { %1066 = vrot.lane.b32.xlu1 %v3539_v33, %s3064_s29  ;;  %v922_v43 = vcombine.low %v3530_v28, %v3539_v33  ;;  %v923_v44 = vcombine.high %v3530_v28, %v3539_v33 }
 0x34c   : > { %v930_v50 = vrot.slane %v922_v43, %v3549_v45  ;;  %v937_v51 = vrot.slane %v923_v44, %v3549_v45 }
 0x34d   : > { %v1063_v40 = vpop.permute.xlu1 %1062 }
 0x34e   : > { %1068 = vrot.lane.b32.xlu1 %v3542_v34, %s3064_s29  ;;  %v954_v56 = vcombine.low %v930_v50, %v946_v52  ;;  %v955_v57 = vcombine.high %v930_v50, %v946_v52  ;;  %v970_v58 = vcombine.low %v937_v51, %v953_v53  ;;  %v971_v59 = vcombine.high %v937_v51, %v953_v53  ;;  %s3920_s29 = sld [smem:[#allocation42_spill]] (!%p2546_p11) }
 0x350   : > { %v962_v2 = vrot.slane %v954_v56, %v3559_v55  ;;  %v969_v3 = vrot.slane %v955_v57, %v3559_v55  ;;  %v978_v4 = vrot.slane %v970_v58, %v3559_v55  ;;  %v985_v5 = vrot.slane %v971_v59, %v3559_v55 }
 0x352   : > { %v990_v15 = vcombine.low %v962_v2, %v969_v3  ;;  %v2514_v16 = vcombine.high %v962_v2, %v969_v3  ;;  %v1006_v17 = vcombine.low %v978_v4, %v985_v5  ;;  %v2515_v18 = vcombine.high %v978_v4, %v985_v5 }
 0x354   : > { %v997_v27 = vrot.slane %v990_v15, %v3549_v45  ;;  %v1005_v29 = vrot.slane %v2514_v16, %v3549_v45  ;;  %v1013_v30 = vrot.slane %v1006_v17, %v3549_v45  ;;  %v1021_v31 = vrot.slane %v2515_v18, %v3549_v45  ;;  %v804_v15 = vld [vmem:[%s3421_s18] sm:$0xf]  ;;  %s3067_s18 = smov 64  }
 0x355   : > { %v805_v16 = vunpack.c.l.bf16 %v804_v15 }
 0x356   : > { %v1022_v46 = vcombine.low %v997_v27, %v1005_v29  ;;  %v1038_v47 = vcombine.low %v1013_v30, %v1021_v31 }
 0x358   : > { %v1046_v56 = vrot.slane %v1038_v47, %v3559_v55 }
 0x3b8   : > { %v1065_v48 = vpop.permute.xlu1 %1064 }
 0x3bc   : > { %v1067_v54 = vpop.permute.xlu1 %1066 }
 0x3bd   : > { %v1074_v60 = vcombine.low %v1063_v40, %v1067_v54  ;;  %v1075_v61 = vcombine.high %v1063_v40, %v1067_v54  ;;  %v1030_v54 = vrot.slane %v1022_v46, %v3559_v55 }
 0x3bf   : > { %v1082_v6 = vrot.slane %v1074_v60, %v3549_v45  ;;  %v1089_v7 = vrot.slane %v1075_v61, %v3549_v45  ;;  %v1023_v61 = vcombine.high %v997_v27, %v1005_v29 }
 0x3c0   : > { %v1069_v62 = vpop.permute.xlu1 %1068 }
 0x3c1   : > { %v1090_v63 = vcombine.low %v1065_v48, %v1069_v62  ;;  %v1091_v0 = vcombine.high %v1065_v48, %v1069_v62  ;;  %v1039_v62 = vcombine.high %v1013_v30, %v1021_v31 }
 0x3c3   : > { %v1098_v8 = vrot.slane %v1090_v63, %v3549_v45  ;;  %v1105_v10 = vrot.slane %v1091_v0, %v3549_v45  ;;  %v1054_v63 = vcombine.low %v1030_v54, %v1046_v56  ;;  %v1055_v0 = vcombine.high %v1030_v54, %v1046_v56 }
 0x3c5   : > { %v1106_v11 = vcombine.low %v1082_v6, %v1098_v8  ;;  %v1107_v12 = vcombine.high %v1082_v6, %v1098_v8  ;;  %v1122_v13 = vcombine.low %v1089_v7, %v1105_v10  ;;  %v1123_v14 = vcombine.high %v1089_v7, %v1105_v10 }
 0x3c6   : > { %v1058_v4 = vpack.c.bf16 %v1054_v63, %v1054_v63  ;;  %v1059_v5 = vpack.c.bf16 %v1055_v0, %v1055_v0  ;;  %v1037_v6 = vrot.slane %v1023_v61, %v3559_v55  ;;  %v1053_v7 = vrot.slane %v1039_v62, %v3559_v55 }
 0x3c7   : > { %v1114_v19 = vrot.slane %v1106_v11, %v3559_v55  ;;  %v1121_v20 = vrot.slane %v1107_v12, %v3559_v55  ;;  %v1130_v21 = vrot.slane %v1122_v13, %v3559_v55  ;;  %v1137_v22 = vrot.slane %v1123_v14, %v3559_v55 }
 0x3c8   : > { %v1056_v11 = vcombine.low %v1037_v6, %v1053_v7  ;;  %v1057_v12 = vcombine.high %v1037_v6, %v1053_v7 }
 0x3c9   : > { %v1142_v23 = vcombine.low %v1114_v19, %v1121_v20  ;;  %v2516_v24 = vcombine.high %v1114_v19, %v1121_v20  ;;  %v1158_v25 = vcombine.low %v1130_v21, %v1137_v22  ;;  %v2517_v26 = vcombine.high %v1130_v21, %v1137_v22 }
 0x3ca   : > { %v1060_v13 = vpack.c.bf16 %v1056_v11, %v1056_v11  ;;  %v1061_v14 = vpack.c.bf16 %v1057_v12, %v1057_v12 }
 0x3cb   : > { %v1149_v35 = vrot.slane %v1142_v23, %v3549_v45  ;;  %v1157_v36 = vrot.slane %v2516_v24, %v3549_v45  ;;  %v1165_v37 = vrot.slane %v1158_v25, %v3549_v45  ;;  %v1173_v38 = vrot.slane %v2517_v26, %v3549_v45 }
 0x3cd   : > { %v1174_v39 = vcombine.low %v1149_v35, %v1157_v36  ;;  %v1190_v40 = vcombine.low %v1165_v37, %v1173_v38  ;;  %v1175_v41 = vcombine.high %v1149_v35, %v1157_v36  ;;  %v1191_v42 = vcombine.high %v1165_v37, %v1173_v38 }
 0x3cf   : > { %v1182_v43 = vrot.slane %v1174_v39, %v3559_v55  ;;  %v1198_v44 = vrot.slane %v1190_v40, %v3559_v55  ;;  %v1189_v50 = vrot.slane %v1175_v41, %v3559_v55  ;;  %v1205_v51 = vrot.slane %v1191_v42, %v3559_v55 }
 0x3d1   : > { %v1206_v48 = vcombine.low %v1182_v43, %v1198_v44  ;;  %v1207_v49 = vcombine.high %v1182_v43, %v1198_v44  ;;  %v1208_v59 = vcombine.low %v1189_v50, %v1205_v51  ;;  %v1209_v60 = vcombine.high %v1189_v50, %v1205_v51 }
 0x3d3   : > { %v1210_v52 = vpack.c.bf16 %v1206_v48, %v1206_v48  ;;  %v1211_v53 = vpack.c.bf16 %v1207_v49, %v1207_v49  ;;  %v1212_v2 = vpack.c.bf16 %v1208_v59, %v1208_v59  ;;  %v1213_v3 = vpack.c.bf16 %v1209_v60, %v1209_v60 }
 0x3d5   : > { %v1371_v57 = vsel %vm1366_vm5, %v1210_v52, 0  ;;  %v1417_v58 = vsel %vm1366_vm5, %v1211_v53, 0  ;;  %v1463_v8 = vsel %vm1366_vm5, %v1212_v2, 0  ;;  %v1509_v10 = vsel %vm1366_vm5, %v1213_v3, 0 }
 0x3d6   : > { %2597 = vmatpush3.bf16.xpose.msra.mxu1 %v1371_v57  ;;  %2603 = vmatpush3.bf16.xpose.msra.mxu0 %v1417_v58 }
 0x3d7   : > { %2608 = vmatprep.subr.bf16.mxu1 %v3059_v9  ;;  %2614 = vmatprep.subr.bf16.mxu0 %v3059_v9 }
 0x3dd   : > { %2599 = vmatmul.mubr.msk.bf16.vlgmr.msra.gmra.mrb[0].mxu1 %vm1366_vm5, %v1058_v4  ;;  %2605 = vmatmul.mubr.msk.bf16.vlgmr.msra.gmra.mrb[4].mxu0 %vm1366_vm5, %v1059_v5 }
 0x3de   : > { %2609 = vmatpush3.bf16.xpose.msra.mxu1 %v1463_v8  ;;  %2615 = vmatpush3.bf16.xpose.msra.mxu0 %v1509_v10 }
 0x3df   : > { %2610 = vmatprep.mubr.msk.bf16.mxu1 %vm3060_vm2, %v3059_v9  ;;  %2616 = vmatprep.mubr.msk.bf16.mxu0 %vm3060_vm2, %v3059_v9 }
 0x3e0   : > { %2620 = vmatprep.subr.bf16.mxu1 %v3059_v9  ;;  %2626 = vmatprep.subr.bf16.mxu0 %v3059_v9 }
 0x3e5   : > { %2611 = vmatmul.mubr.msk.bf16.vlgmr.msra.gmra.mrb[4].mxu1 %vm1366_vm5, %v1060_v13  ;;  %2617 = vmatmul.mubr.msk.bf16.vlgmr.msra.gmra.mrb[8].mxu0 %vm1366_vm5, %v1061_v14 }
 0x3e6   : > { %2622 = vmatprep.mubr.msk.bf16.mxu1 %vm3060_vm2, %v3059_v9  ;;  %2628 = vmatprep.mubr.msk.bf16.mxu0 %vm3060_vm2, %v3059_v9 }
 0x4b0   : > { %v1407_v17 = vpop.f32.mrb[0].mxu1  ;;  %v1453_v18 = vpop.f32.mrb[4].mxu0 }
 0x4b1   : > { %v1408_v19 = vadd.f32 %v1407_v17, %v805_v16  ;;  %v1454_v20 = vadd.f32 %v1453_v18, %v805_v16  ;;  %v2600_v21 = vpop.f32.mrb[1].mxu1  ;;  %v2606_v22 = vpop.f32.mrb[5].mxu0 }
 0x4b2   : > { %v1410_v23 = vpop.f32.mrb[2].mxu1  ;;  %v1456_v24 = vpop.f32.mrb[6].mxu0 }
 0x4b3   : > { %v2601_v25 = vpop.f32.mrb[3].mxu1  ;;  %v2607_v26 = vpop.f32.mrb[7].mxu0  ;;  %v1551_v27 = vsel %vm1366_vm5, %v1408_v19, -inf  ;;  %v1554_v29 = vsel %vm1366_vm5, %v1454_v20, -inf }
 0x4b4   : > { %1552 = vmax.xlane.f32.xlu1 %v1551_v27  ;;  %1555 = vmax.xlane.f32.xlu0 %v1554_v29 }
 0x4b8   : > { %v1499_v30 = vpop.f32.mrb[4].mxu1  ;;  %v1545_v31 = vpop.f32.mrb[8].mxu0 }
 0x4b9   : > { %v1500_v35 = vadd.f32 %v1499_v30, %v805_v16  ;;  %v1546_v36 = vadd.f32 %v1545_v31, %v805_v16  ;;  %v2612_v37 = vpop.f32.mrb[5].mxu1  ;;  %v2618_v38 = vpop.f32.mrb[9].mxu0 }
 0x4ba   : > { %v1502_v39 = vpop.f32.mrb[6].mxu1  ;;  %v1548_v40 = vpop.f32.mrb[10].mxu0 }
 0x4bb   : > { %v2613_v41 = vpop.f32.mrb[7].mxu1  ;;  %v2619_v42 = vpop.f32.mrb[11].mxu0  ;;  %v1557_v43 = vsel %vm1366_vm5, %v1500_v35, -inf  ;;  %v1560_v44 = vsel %vm1366_vm5, %v1546_v36, -inf }
 0x4bc   : > { %1558 = vmax.xlane.f32.xlu1 %v1557_v43  ;;  %1561 = vmax.xlane.f32.xlu0 %v1560_v44 }
 0x4cd   : > { %1214 = vrot.lane.b32.xlu1 %v3530_v28, %s3067_s18 }
 0x541   : > { %v1553_v46 = vpop.xlane.xlu1 %1552  ;;  %v1556_v47 = vpop.xlane.xlu0 %1555 }
 0x542   : > { %v1563_v48 = vsub.f32 %v1408_v19, %v1553_v46  ;;  %v1564_v49 = vsub.f32 %v1454_v20, %v1556_v47 }
 0x544   : > { %v1567_v50 = vmul.f32 1.442695, %v1563_v48  ;;  %v1569_v51 = vmul.f32 1.442695, %v1564_v49 }
 0x546   : > { %2810 = vpow2.f32 %v1567_v50 }
 0x547   : > { %2812 = vpow2.f32 %v1569_v51 }
 0x549   : > { %v1559_v28 = vpop.xlane.xlu1 %1558  ;;  %v1562_v58 = vpop.xlane.xlu0 %1561 }
 0x54a   : > { %v1565_v57 = vsub.f32 %v1500_v35, %v1559_v28  ;;  %v1566_v59 = vsub.f32 %v1546_v36, %v1562_v58 }
 0x54c   : > { %v1571_v60 = vmul.f32 1.442695, %v1565_v57  ;;  %v1573_v61 = vmul.f32 1.442695, %v1566_v59 }
 0x54e   : > { %2814 = vpow2.f32 %v1571_v60 }
 0x54f   : > { %2816 = vpow2.f32 %v1573_v61 }
 0x550   : > { %v3615_v52 = vpop.eup %2810 }
 0x551   : > { %v3617_v53 = vpop.eup %2812  ;;  %v1575_v54 = vsel %vm1366_vm5, %v3615_v52, 0.0 }
 0x552   : > { %1576 = vadd.xlane.f32.xlu1 %v1575_v54  ;;  %v1578_v56 = vsel %vm1366_vm5, %v3617_v53, 0.0 }
 0x553   : > { %1579 = vadd.xlane.f32.xlu0 %v1578_v56 }
 0x558   : > { %v3626_v62 = vpop.eup %2814 }
 0x559   : > { %v3628_v63 = vpop.eup %2816  ;;  %v1581_v0 = vsel %vm1366_vm5, %v3626_v62, 0.0 }
 0x563   : > { %1218 = vrot.lane.b32.xlu1 %v3539_v33, %s3067_s18  ;;  %v1584_v33 = vsel %vm1366_vm5, %v3628_v63, 0.0 }
 0x567   : > { %1220 = vrot.lane.b32.xlu1 %v3542_v34, %s3067_s18 }
 0x569   : > { %1216 = vrot.lane.b32.xlu0 %v3536_v32, %s3067_s18  ;;  %v1215_v32 = vpop.permute.xlu1 %1214 }
 0x588   : > { %1582 = vadd.xlane.f32.xlu0 %v1581_v0 }
 0x58b   : > { %1585 = vadd.xlane.f32.xlu1 %v1584_v33 }
 0x5df   : > { %v1577_v34 = vpop.xlane.xlu1 %1576 }
 0x5e0   : > { %v1580_v2 = vpop.xlane.xlu0 %1579  ;;  %2818 = vrcp.f32 %v1577_v34 }
 0x5e1   : > { %2820 = vrcp.f32 %v1580_v2 }
 0x5e3   : > { %v1219_v3 = vpop.permute.xlu1 %1218 }
 0x5e4   : > { %v1226_v4 = vcombine.low %v1215_v32, %v1219_v3  ;;  %v1227_v5 = vcombine.high %v1215_v32, %v1219_v3  ;;  %v1217_v6 = vpop.permute.xlu0 %1216 }
 0x5e6   : > { %v1234_v11 = vrot.slane %v1226_v4, %v3549_v45  ;;  %v1241_v12 = vrot.slane %v1227_v5, %v3549_v45 }
 0x5e7   : > { %v1221_v7 = vpop.permute.xlu1 %1220 }
 0x5e8   : > { %v1242_v8 = vcombine.low %v1217_v6, %v1221_v7  ;;  %v1243_v10 = vcombine.high %v1217_v6, %v1221_v7  ;;  %v2798_v6 = vld [vmem:[%s3912_s13] sm:$0xff]  }
 0x5ea   : > { %v1250_v13 = vrot.slane %v1242_v8, %v3549_v45  ;;  %v1257_v14 = vrot.slane %v1243_v10, %v3549_v45  ;;  %v2819_v41 = vpop.eup %2818 }
 0x5eb   : > { %v2821_v44 = vpop.eup %2820  ;;  %v1591_v50 = vmul.f32 %v2819_v41, %v3615_v52 }
 0x5ec   : > { %v1258_v15 = vcombine.low %v1234_v11, %v1250_v13  ;;  %v1259_v16 = vcombine.high %v1234_v11, %v1250_v13  ;;  %v1274_v17 = vcombine.low %v1241_v12, %v1257_v14  ;;  %v1275_v18 = vcombine.high %v1241_v12, %v1257_v14 }
 0x5ed   : > { %v1592_v51 = vmul.f32 %v2821_v44, %v3617_v53  ;;  %v1595_v60 = vpack.c.bf16 %v1591_v50, %v1591_v50 }
 0x5ee   : > { %v1266_v19 = vrot.slane %v1258_v15, %v3559_v55  ;;  %v1273_v20 = vrot.slane %v1259_v16, %v3559_v55  ;;  %v1282_v21 = vrot.slane %v1274_v17, %v3559_v55  ;;  %v1289_v22 = vrot.slane %v1275_v18, %v3559_v55 }
 0x5ef   : > { %v1596_v61 = vpack.c.bf16 %v1592_v51, %v1592_v51 }
 0x5f0   : > { %v1294_v23 = vcombine.low %v1266_v19, %v1273_v20  ;;  %v2518_v24 = vcombine.high %v1266_v19, %v1273_v20  ;;  %v1310_v25 = vcombine.low %v1282_v21, %v1289_v22  ;;  %v2519_v26 = vcombine.high %v1282_v21, %v1289_v22 }
 0x5f2   : > { %v1301_v27 = vrot.slane %v1294_v23, %v3549_v45  ;;  %v1309_v29 = vrot.slane %v2518_v24, %v3549_v45  ;;  %v1317_v30 = vrot.slane %v1310_v25, %v3549_v45  ;;  %v1325_v31 = vrot.slane %v2519_v26, %v3549_v45 }
 0x5f4   : > { %v1326_v35 = vcombine.low %v1301_v27, %v1309_v29  ;;  %v1327_v36 = vcombine.high %v1301_v27, %v1309_v29  ;;  %v1342_v37 = vcombine.low %v1317_v30, %v1325_v31  ;;  %v1343_v38 = vcombine.high %v1317_v30, %v1325_v31 }
 0x5f6   : > { %v1334_v39 = vrot.slane %v1326_v35, %v3559_v55  ;;  %v1341_v40 = vrot.slane %v1327_v36, %v3559_v55  ;;  %v1350_v42 = vrot.slane %v1342_v37, %v3559_v55  ;;  %v1357_v43 = vrot.slane %v1343_v38, %v3559_v55  ;;  %v2799_v38 = vld [vmem:[%s3912_s13 + $0x8] sm:$0xff]  }
 0x5f8   : > { %v1358_v46 = vcombine.low %v1334_v39, %v1350_v42  ;;  %v1359_v47 = vcombine.high %v1334_v39, %v1350_v42  ;;  %v1360_v48 = vcombine.low %v1341_v40, %v1357_v43  ;;  %v1361_v49 = vcombine.high %v1341_v40, %v1357_v43 }
 0x5fa   : > { %v1362_v54 = vpack.c.bf16 %v1358_v46, %v1358_v46  ;;  %v1363_v56 = vpack.c.bf16 %v1359_v47, %v1359_v47  ;;  %v1364_v58 = vpack.c.bf16 %v1360_v48, %v1360_v48  ;;  %v1365_v59 = vpack.c.bf16 %v1361_v49, %v1361_v49 }
 0x5fc   : > { %v1604_v28 = vsel %vm1602_vm6, %v1362_v54, 0  ;;  %v1650_v57 = vsel %vm1602_vm6, %v1363_v56, 0  ;;  %v1696_v52 = vsel %vm1602_vm6, %v1364_v58, 0  ;;  %v1742_v53 = vsel %vm1602_vm6, %v1365_v59, 0 }
 0x5fd   : > { %2621 = vmatpush3.bf16.msra.mxu1 %v1604_v28  ;;  %2627 = vmatpush3.bf16.msra.mxu0 %v1650_v57 }
 0x5fe   : > { %2632 = vmatprep.subr.bf16.mxu1 %v3059_v9  ;;  %2638 = vmatprep.subr.bf16.mxu0 %v3059_v9 }
 0x600   : > { %2623 = vmatmul.mubr.msk.bf16.vlgmr.msra.gmra.mrb[8].mxu1 %vm1366_vm5, %v1595_v60  ;;  %2629 = vmatmul.mubr.msk.bf16.vlgmr.msra.gmra.mrb[12].mxu0 %vm1366_vm5, %v1596_v61 }
 0x601   : > { %2633 = vmatpush3.bf16.msra.mxu1 %v1696_v52  ;;  %2639 = vmatpush3.bf16.msra.mxu0 %v1742_v53 }
 0x602   : > { %2634 = vmatprep.mubr.msk.bf16.mxu1 %vm3060_vm2, %v3059_v9  ;;  %2640 = vmatprep.mubr.msk.bf16.mxu0 %vm3060_vm2, %v3059_v9 }
 0x603   : > { %2644 = vmatprep.subr.bf16.mxu1 %v3059_v9  ;;  %2652 = vmatprep.subr.bf16.mxu0 %v3059_v9 }
 0x615   : > { %v1583_v0 = vpop.xlane.xlu0 %1582 }
 0x616   : > { %2822 = vrcp.f32 %v1583_v0 }
 0x618   : > { %v1586_v33 = vpop.xlane.xlu1 %1585 }
 0x619   : > { %2824 = vrcp.f32 %v1586_v33 }
 0x620   : > { %v2823_v32 = vpop.eup %2822 }
 0x621   : > { %v1593_v34 = vmul.f32 %v2823_v32, %v3626_v62 }
 0x623   : > { %v2825_v2 = vpop.eup %2824  ;;  %v1597_v3 = vpack.c.bf16 %v1593_v34, %v1593_v34 }
 0x624   : > { %v1594_v4 = vmul.f32 %v2825_v2, %v3628_v63 }
 0x625   : > { %2635 = vmatmul.mubr.msk.bf16.vlgmr.msra.gmra.mrb[12].mxu1 %vm1366_vm5, %v1597_v3 }
 0x626   : > { %v1598_v5 = vpack.c.bf16 %v1594_v4, %v1594_v4  ;;  %2648 = vmatprep.mubr.msk.bf16.mxu1 %vm3060_vm2, %v3059_v9  ;;  %2645 = vmatpush3.bf16.msra.mxu1 %v2798_v6 }
 0x627   : > { %2646 = vmatprep.subr.bf16.mxu1 %v3059_v9 }
 0x628   : > { %2641 = vmatmul.mubr.msk.bf16.vlgmr.msra.gmra.mrb[16].mxu0 %vm1366_vm5, %v1598_v5  ;;  %v2530_v5 = vld [vmem:[%s3914_s14] ss:$0 sm:$0xff] }
 0x629   : > { %2656 = vmatprep.mubr.msk.bf16.mxu0 %vm3060_vm2, %v3059_v9 }
 0x62a   : > { %2647 = vmatpush3.bf16.msra.mxu1 %v2799_v38 }
 0x62b   : > { %2660 = vmatprep.subr.bf16.mxu1 %v3059_v9 }
 0x6d3   : > { %v1640_v62 = vpop.f32.mrb[8].mxu1  ;;  %v1686_v7 = vpop.f32.mrb[12].mxu0 }
 0x6d4   : > { %v2624_v8 = vpop.f32.mrb[9].mxu1  ;;  %v2630_v10 = vpop.f32.mrb[13].mxu0 }
 0x6d5   : > { %v1643_v63 = vpop.f32.mrb[10].mxu1  ;;  %v1689_v11 = vpop.f32.mrb[14].mxu0 }
 0x6d6   : > { %v2625_v12 = vpop.f32.mrb[11].mxu1  ;;  %v2631_v13 = vpop.f32.mrb[15].mxu0 }
 0x6f8   : > { %v1732_v14 = vpop.f32.mrb[12].mxu1 }
 0x6f9   : > { %v1784_v15 = vcombine.low %v1640_v62, %v1732_v14  ;;  %v1785_v16 = vcombine.high %v1640_v62, %v1732_v14  ;;  %v2636_v17 = vpop.f32.mrb[13].mxu1 }
 0x6fa   : > { %v1735_v18 = vpop.f32.mrb[14].mxu1  ;;  %v2800_v17 = vld [vmem:[%s3476_s0] sm:$0xff]  }
 0x6fb   : > { %v2637_v19 = vpop.f32.mrb[15].mxu1  ;;  %v1778_v20 = vpop.f32.mrb[16].mxu0  ;;  %v1792_v25 = vrot.slane %v1784_v15, %v3549_v45  ;;  %v1799_v26 = vrot.slane %v1785_v16, %v3549_v45  ;;  %2653 = vmatpush3.bf16.msra.mxu0 %v2800_v17  ;;  %v2801_v18 = vld [vmem:[%s3476_s0 + $0x8] sm:$0xff]   ;;  %s3915_s0 = sld [smem:[#allocation28_spill]] }
 0x6fc   : > { %v1800_v21 = vcombine.low %v1686_v7, %v1778_v20  ;;  %v1801_v22 = vcombine.high %v1686_v7, %v1778_v20  ;;  %v2642_v23 = vpop.f32.mrb[17].mxu0  ;;  %2654 = vmatprep.subr.bf16.mxu0 %v3059_v9  ;;  %v2802_v19 = vld [vmem:[%s3486_s20] sm:$0xff]  }
 0x6fd   : > { %v1781_v24 = vpop.f32.mrb[18].mxu0 }
 0x6fe   : > { %v1808_v27 = vrot.slane %v1800_v21, %v3549_v45  ;;  %v1815_v29 = vrot.slane %v1801_v22, %v3549_v45  ;;  %v2643_v30 = vpop.f32.mrb[19].mxu0 }
 0x6ff   : > { %2655 = vmatpush3.bf16.msra.mxu0 %v2801_v18 }
 0x700   : > { %v1816_v31 = vcombine.low %v1792_v25, %v1808_v27  ;;  %v1817_v35 = vcombine.high %v1792_v25, %v1808_v27  ;;  %v1832_v36 = vcombine.low %v1799_v26, %v1815_v29  ;;  %v1833_v37 = vcombine.high %v1799_v26, %v1815_v29  ;;  %v2534_v29 = vld [vmem:[%s778_s23] ss:$0 sm:$0xff] }
 0x702   : > { %v1824_v39 = vrot.slane %v1816_v31, %v3559_v55  ;;  %v1831_v40 = vrot.slane %v1817_v35, %v3559_v55  ;;  %v1840_v41 = vrot.slane %v1832_v36, %v3559_v55  ;;  %v1847_v42 = vrot.slane %v1833_v37, %v3559_v55  ;;  %v2535_v35 = vld [vmem:[%s781_s22] ss:$0 sm:$0xff] }
 0x704   : > { %v1852_v43 = vcombine.low %v1824_v39, %v1831_v40  ;;  %v2528_v44 = vcombine.high %v1824_v39, %v1831_v40  ;;  %v1868_v46 = vcombine.low %v1840_v41, %v1847_v42  ;;  %v2529_v47 = vcombine.high %v1840_v41, %v1847_v42  ;;  %v2804_v39 = vld [vmem:[%s3486_s20 + $0x10] sm:$0xff]   ;;  %v2805_v40 = vld [vmem:[%s3486_s20 + $0x18] sm:$0xff]   ;;  %v2536_v41 = vld [vmem:[%s3915_s0] ss:$0 sm:$0xff] }
 0x706   : > { %v1859_v48 = vrot.slane %v1852_v43, %v3549_v45  ;;  %v1867_v49 = vrot.slane %v2528_v44, %v3549_v45  ;;  %v1875_v50 = vrot.slane %v1868_v46, %v3549_v45  ;;  %v1883_v51 = vrot.slane %v2529_v47, %v3549_v45 }
 0x708   : > { %v1885_v54 = vcombine.high %v1859_v48, %v1867_v49  ;;  %v1901_v56 = vcombine.high %v1875_v50, %v1883_v51  ;;  %v1884_v28 = vcombine.low %v1859_v48, %v1867_v49  ;;  %v1900_v57 = vcombine.low %v1875_v50, %v1883_v51  ;;  %v2540_v50 = vld [vmem:[%s794_s7] ss:$0 sm:$0xff] }
 0x70a   : > { %v1899_v58 = vrot.slane %v1885_v54, %v3559_v55  ;;  %v1915_v59 = vrot.slane %v1901_v56, %v3559_v55  ;;  %v1892_v60 = vrot.slane %v1884_v28, %v3559_v55  ;;  %v1908_v61 = vrot.slane %v1900_v57, %v3559_v55 }
 0x70c   : > { %v1918_v52 = vcombine.low %v1899_v58, %v1915_v59  ;;  %v1917_v53 = vcombine.high %v1892_v60, %v1908_v61  ;;  %v1919_v0 = vcombine.high %v1899_v58, %v1915_v59  ;;  %v1916_v33 = vcombine.low %v1892_v60, %v1908_v61 }
 0x70e   : > { %1925 = vrot.lane.b32.xlu1 %v1918_v52, %s3068_s26  ;;  %1921 = vrot.lane.b32.xlu0 %v1917_v53, %s3069_s25 }
 0x712   : > { %1929 = vrot.lane.b32.xlu0 %v1919_v0, %s3070_s1 }
 0x780   : > { %v1922_v45 = vpop.permute.xlu0 %1921  ;;  %v1926_v32 = vpop.permute.xlu1 %1925 }
 0x781   : > { %v1932_v34 = vsel %vm1366_vm5, %v1916_v33, %v1922_v45 }
 0x782   : > { %v1934_v3 = vsel %vm1933_vm7, %v1932_v34, %v1926_v32 }
 0x784   : > { %v1930_v2 = vpop.permute.xlu0 %1929 }
 0x785   : > { %v1936_v55 = vsel %vm1935_vm8, %v1934_v3, %v1930_v2 }
 0x786   : > { %v1937_v4 = vpack.c.bf16 %v1936_v55, %v1936_v55 }
 0x788   : > { %2649 = vmatmul.mubr.msk.bf16.vlgmr.msra.gmra.mrb[16].mxu1 %vm808_vm1, %v1937_v4 }
 0x789   : > { %2668 = vmatprep.mubr.msk.bf16.mxu1 %vm3060_vm2, %v3059_v9  ;;  %2661 = vmatpush3.bf16.msra.mxu1 %v2802_v19 }
 0x78a   : > { %2662 = vmatprep.subr.bf16.mxu1 %v3059_v9 }
 0x85b   : > { %v1998_v6 = vpop.f32.mrb[16].mxu1 }
 0x85c   : > { %v1999_v62 = vadd.f32 %v2530_v5, %v1998_v6  ;;  %v2650_v7 = vpop.f32.mrb[17].mxu1 }
 0x85d   : > { %v2001_v8 = vpop.f32.mrb[18].mxu1 }
 0x85e   : > { %v2004_v10 = vadd.f32 %v1999_v62, %v3496_v1  ;;  %v2651_v63 = vpop.f32.mrb[19].mxu1  ;;  %v2803_v1 = vld [vmem:[%s3486_s20 + $0x8] sm:$0xff]   ;;  %s3919_s20 = sld [smem:[#allocation41_spill]] (!%p2546_p11)  ;;  %v2548_v62 = vld [vmem:[%s3920_s29] ss:$0 sm:$0xff] (!%p2546_p11) }
 0x85f   : > { %2663 = vmatpush3.bf16.msra.mxu1 %v2803_v1 }
 0x860   : > { %v2007_v11 = vsel %vm808_vm1, %v2004_v10, 0.0  ;;  %2664 = vmatprep.subr.bf16.mxu1 %v3059_v9 }
 0x861   : > { %2008 = vadd.xlane.f32.xlu1 %v2007_v11 }
 0x863   : > { %2665 = vmatpush3.bf16.msra.mxu1 %v2804_v39 }
 0x864   : > { %2666 = vmatprep.subr.bf16.mxu1 %v3059_v9  ;;  %v2547_v4 = vld [vmem:[%s3919_s20] ss:$0 sm:$0xff] (!%p2546_p11) }
 0x867   : > { %2667 = vmatpush3.bf16.msra.mxu1 %v2805_v40 }
 0x8ee   : > { %v2009_v12 = vpop.xlane.xlu1 %2008 }
 0x8ef   : > { %v2010_v13 = vmul.f32 0.03125, %v2009_v12 }
 0x8f1   : > { %v2011_v14 = vsub.f32 %v2004_v10, %v2010_v13 }
 0x8f3   : > { %v2012_v15 = vmul.f32 %v2011_v14, %v2011_v14  ;;  %v2023_v30 = vmul.f32 %v2534_v29, %v2011_v14 }
 0x8f5   : > { %v2013_v16 = vsel %vm808_vm1, %v2012_v15, 0.0 }
 0x8f6   : > { %2014 = vadd.xlane.f32.xlu0 %v2013_v16 }
 0x983   : > { %v2015_v20 = vpop.xlane.xlu0 %2014 }
 0x984   : > { %v2016_v21 = vmul.f32 0.032258064, %v2015_v20 }
 0x986   : > { %v2024_v22 = vadd.f32 1e-06, %v2016_v21 }
 0x988   : > { %2826 = vrsqrt.f32 %v2024_v22  ;;  %vm2027_vm9 = vcmp.eq.f32.partialorder %v2024_v22, inf  ;;  %v2030_v25 = vand.u32 2147483648, %v2024_v22  ;;  %vm2029_vm10 = vcmp.eq.f32.partialorder %v2024_v22, 0.0 }
 0x992   : > { %v2827_v23 = vpop.eup %2826 }
 0x993   : > { %v2026_v24 = vmul.f32 %v2827_v23, %v2024_v22 }
 0x995   : > { %v2028_v26 = vsel %vm2027_vm9, %v2024_v22, %v2026_v24 }
 0x996   : > { %v2031_v27 = vsel %vm2029_vm10, %v2030_v25, %v2028_v26 }
 0x997   : > { %2828 = vrcp.f32 %v2031_v27 }
 0x9a1   : > { %v2829_v31 = vpop.eup %2828 }
 0x9a2   : > { %v2033_v36 = vmul.f32 %v2829_v31, %v2023_v30 }
 0x9a4   : > { %v2040_v37 = vadd.f32 %v2535_v35, %v2033_v36 }
 0x9a6   : > { %v2041_v38 = vpack.c.bf16 %v2040_v37, %v2040_v37 }
 0x9a8   : > { %2657 = vmatmul.mubr.msk.bf16.vlgmr.msra.gmra.mrb[20].mxu0 %vm808_vm1, %v2041_v38 }
 0xa7b   : > { %v2102_v42 = vpop.f32.mrb[20].mxu0 }
 0xa7c   : > { %v2103_v43 = vadd.f32 %v2536_v41, %v2102_v42  ;;  %v2658_v44 = vpop.f32.mrb[21].mxu0 }
 0xa7d   : > { %v2105_v46 = vpop.f32.mrb[22].mxu0 }
 0xa7e   : > { %v2108_v47 = vmax.f32 %v2103_v43, 0.0  ;;  %v2659_v48 = vpop.f32.mrb[23].mxu0 }
 0xa80   : > { %v2109_v49 = vpack.c.bf16 %v2108_v47, %v2108_v47 }
 0xa82   : > { %2669 = vmatmul.mubr.msk.bf16.vlgmr.msra.gmra.mrb[20].mxu1 %vm2149_vm11, %v2109_v49 }
 0xb52   : > { %2197 = sbr.rel (%p2546_p11) target bundleno = 3233 (0xca1), region = 104 }
 0xb55   : > { %v2187_v51 = vpop.f32.mrb[20].mxu1 }
 0xb56   : > { %v2188_v54 = vadd.f32 %v2540_v50, %v2187_v51  ;;  %v2670_v9 = vpop.f32.mrb[21].mxu1 }
 0xb57   : > { %v2190_v56 = vpop.f32.mrb[22].mxu1 }
 0xb58   : > { %v2193_v28 = vadd.f32 %v2188_v54, %v2004_v10  ;;  %v2671_v57 = vpop.f32.mrb[23].mxu1 }
 0xb5a   : > { %v2200_v58 = vsel %vm808_vm1, %v2193_v28, 0.0 }
 0xb5b   : > { %2201 = vadd.xlane.f32.xlu0 %v2200_v58 }
 0xbe8   : > { %v2202_v59 = vpop.xlane.xlu0 %2201 }
 0xbe9   : > { %v2203_v60 = vmul.f32 0.03125, %v2202_v59 }
 0xbeb   : > { %v2204_v61 = vsub.f32 %v2193_v28, %v2203_v60 }
 0xbed   : > { %v2205_v52 = vmul.f32 %v2204_v61, %v2204_v61  ;;  %v2216_v5 = vmul.f32 %v2547_v4, %v2204_v61 }
 0xbef   : > { %v2206_v53 = vsel %vm808_vm1, %v2205_v52, 0.0 }
 0xbf0   : > { %2207 = vadd.xlane.f32.xlu0 %v2206_v53 }
 0xc7d   : > { %v2208_v0 = vpop.xlane.xlu0 %2207 }
 0xc7e   : > { %v2209_v33 = vmul.f32 0.032258064, %v2208_v0 }
 0xc80   : > { %v2217_v45 = vadd.f32 1e-06, %v2209_v33 }
 0xc82   : > { %2830 = vrsqrt.f32 %v2217_v45  ;;  %vm2220_vm12 = vcmp.eq.f32.partialorder %v2217_v45, inf  ;;  %v2223_v2 = vand.u32 2147483648, %v2217_v45  ;;  %vm2222_vm13 = vcmp.eq.f32.partialorder %v2217_v45, 0.0 }
 0xc8c   : > { %v2831_v32 = vpop.eup %2830 }
 0xc8d   : > { %v2219_v34 = vmul.f32 %v2831_v32, %v2217_v45 }
 0xc8f   : > { %v2221_v3 = vsel %vm2220_vm12, %v2217_v45, %v2219_v34 }
 0xc90   : > { %v2224_v55 = vsel %vm2222_vm13, %v2223_v2, %v2221_v3 }
 0xc91   : > { %2832 = vrcp.f32 %v2224_v55 }
 0xc9b   : > { %v2833_v6 = vpop.eup %2832 }
 0xc9c   : > { %v2226_v7 = vmul.f32 %v2833_v6, %v2216_v5 }
 0xc9e   : > { %v2233_v8 = vadd.f32 %v2548_v62, %v2226_v7 }
 0xca0   : > { %2234 = vst.msk [vmem:[%s3490_s28] sm:$0xff] %vm808_vm1, %v2233_v8 }
 0xca1 PF: > { %p2549_p7 = scmp.ge.s32.totalorder %s3038_s27, 1 }
 0xca2   : > { %2239 = vst.msk [vmem:[%s3490_s28] sm:$0xff] (!%p2549_p7), %vm808_vm1, %v2193_v28 }
 0xca3   : > { %2238 = sbr.rel (%p2549_p7) target bundleno = 3242 (0xcaa), region = 108 }
 0xcaa PF: > { %s3921_s18 = sld [smem:[#allocation18_spill]]  ;;  %s3922_s13 = sld [smem:[#allocation22_spill]] }
 0xcab   : > { %s3923_s12 = sld [smem:[#allocation43_spill]]  ;;  %s2254_s19 = sshll.u32 %s3490_s28, 4  ;;  %s2255_s19 = int_to_ptr.vmem [resolvable:$true] %s2254_s19 }
 0xcac   : > { %s2241_s14 = scalar_lea.sflag [#allocation4], %s3407_s10  ;;  %s2924_s0 = scalar_lea.vmem %s2255_s19, 128 }
 0xcad   : > { %p2925_p3 = scmp.ne.s32.totalorder %s2255_s19, %s2924_s0  ;;  %s3071_s27 = smov [#allocation8]  }
 0xcae   : > { %s2928_s9 = sshll.u32 %s3071_s27, 4  ;;  %s2929_s9 = int_to_ptr.vmem [resolvable:$false] %s2928_s9 }
 0xcaf   : > { %s2930_s15 = scalar_lea.vmem %s2929_s9, 256  ;;  %p2931_p6 = scmp.lt.s32.totalorder %s2255_s19, %s2929_s9 }
 0xcb0   : > { %s2551_s26 = sshll.u32 %s3921_s18, 7  ;;  %p3924_p10 = scmp.ne.s32.totalorder %s3922_s13, 0 }
 0xcb1   : > { %s3751_s11 = scalar_lea.hbm %s3923_s12, %s2551_s26  ;;  %p2932_p12 = scmp.lt.s32.totalorder %s2930_s15, %s2924_s0 }
 0xcb2   : > { %p2926_p8 = pnand %p2925_p3, %p3924_p10 }
 0xcb3   : > { %p2933_p4 = por %p2932_p12, %p2931_p6 }
 0xcb4   : > { %p2927_p2 = pneg %p2926_p8 }
 0xcb6   : > { %p2934_p5 = pnand %p2933_p4, %p2927_p2 }
 0xcb8   : > { %2937 = shalt.err (!%p2934_p5)
}
 0xcb9   : > { %s2938_s10 = scalar_lea.hbm %s3751_s11, 128  ;;  %s2942_s8 = scalar_lea.hbm %s3923_s12, 256 }
 0xcba   : > { %p2939_p0 = scmp.ne.s32.totalorder %s3751_s11, %s2938_s10  ;;  %p2943_p1 = scmp.lt.u32.totalorder %s3751_s11, %s3923_s12 }
 0xcbb   : > { %p2944_p11 = scmp.lt.u32.totalorder %s2942_s8, %s2938_s10  ;;  %p2946_p3 = scmp.lt.u32.totalorder %s2938_s10, %s3751_s11 }
 0xcbc   : > { %p2940_p13 = pnand %p2939_p0, %p3924_p10 }
 0xcbd   : > { %p2945_p7 = por %p2944_p11, %p2943_p1 }
 0xcbe   : > { %p2941_p9 = pneg %p2940_p13 }
 0xcbf   : > { %p2947_p8 = por %p2946_p3, %p2945_p7 }
 0xcc1   : > { %p2948_p2 = pnand %p2947_p8, %p2941_p9 }
 0xcc3   : > { %2951 = shalt.err (!%p2948_p2)
}
 0xcc4   : > { %2678 = dma.vmem_to_hbm [thread:$0]  (%p3924_p10), %s2255_s19, 128, %s3751_s11, %s2241_s14  }
 0xcc5 PF: > { %s3925_s22 = sld [smem:[#allocation21_spill]]  ;;  %s3926_s23 = sld [smem:[#allocation15_spill]] }
 0xcc6   : > { %s3927_s6 = sld [smem:[#allocation23_spill]] }
 0xccb   : > { %p2695_p6 = scmp.ge.s32.totalorder %s3925_s22, 2  ;;  %s2266_s7 = sand.u32 1, %s3926_s23  }
 0xccc   : > { %p3928_p12 = scmp.ne.s32.totalorder %s3927_s6, 0  ;;  %s2267_s17 = scalar_lea.sflag [#allocation4], %s2266_s7 }
 0xcce   : > { %p2691_p4 = pnand %p2695_p6, %p3928_p12 }
 0xcd0   : > { %3009 = dma.done.wait (!%p2691_p4), %s2267_s17, 128  }
 0xcd1   : > { %3011 = vsyncadd (!%p2691_p4), %s2267_s17, 4294967168  ;;  %s35_s0 = sadd.s32 1, %s3925_s22   ;;  %s3929_s21 = sld [smem:[#allocation13_spill]] }
 0xcd2   : > { %p32_p5 = scmp.ge.s32.totalorder %s35_s0, 6   ;;  %s3930_s22 = sld [smem:[#allocation14_spill]] }
 0xcd3   : > { %s3931_s23 = sld [smem:[#allocation26_spill]]  ;;  %s3932_s24 = sld [smem:[#allocation16_spill]] }
 0xcd4   : > { %s3933_s25 = sld [smem:[#allocation17_spill]]  ;;  %s3934_s26 = sld [smem:[#allocation27_spill]] }
 0xcd5   : > { %s3935_s27 = sld [smem:[#allocation19_spill]]  ;;  %s3936_s28 = sld [smem:[#allocation20_spill]] }
 0xcd6   : > { %s3937_s29 = sld [smem:[#allocation24_spill]]  ;;  %s3938_s30 = sld [smem:[#allocation25_spill]] }
 0xcd7   :  { %34 = sbr.rel (!%p32_p5) target bundleno = 26 (0x1a), region = 198 }
 0xcde   :  { %2272 = vsyncpa [#allocation3], 1 }
 0xcdf   :  { %2274 = vsyncpa [#allocation3 + $0x1], 1 }
 0xce0   :  { %2275 = vsyncpa [#allocation6], 1 }
 0xce1   :  { %2277 = vsyncpa [#allocation6 + $0x1], 1 }
 0xce2   :  { %2278 = vsyncpa [#allocation4], 1 }
 0xce3   :  { %2280 = vsyncpa [#allocation4 + $0x1], 1 }

</bundles_post_ra>
